<compile_context>
chip_gen: v6e
topology: v6e:2x2x1
jax: 0.10.0
libtpu: 0.0.40
codegen_flags: <defaults>
</compile_context>

<pallas_src>
import functools
import math

import jax
import jax.numpy as jnp
from jax import lax
from jax.experimental import pallas as pl
from jax.experimental.pallas import tpu as pltpu


def _layernorm(y, g, b, eps):
    mu = jnp.mean(y, axis=-1, keepdims=True)
    var = jnp.mean((y - mu) ** 2, axis=-1, keepdims=True)
    return (y - mu) * lax.rsqrt(var + eps) * g + b


# ----------------------------------------------------------------------------
# Pallas kernel: one (tq, d) query tile of one batch element per grid step.
# ----------------------------------------------------------------------------
def _encoder_layer_kernel(xq_ref, xkv_ref,
                          wq_ref, bq_ref, wkv_ref, bkv_ref,
                          wo_ref, bo_ref,
                          w1_ref, b1_ref, w2_ref, b2_ref,
                          g1_ref, bt1_ref, g2_ref, bt2_ref,
                          o_ref, kt_ref, v_ref, oh_ref,
                          *, nhead, dh, eps):
    xq = xq_ref[...]                          # (tq, d) f32 -- residual path stays f32
    xq_b = xq.astype(jnp.bfloat16)            # bf16 MXU operand
    tq, d = xq.shape

    # ---- K / V projections: one fused (S, d) @ (d, 2d) matmul, computed once per
    #      batch element (first query tile), cached per head in VMEM scratch. ----
    @pl.when(pl.program_id(1) == 0)
    def _compute_kv():
        kv = jnp.dot(xkv_ref[...], wkv_ref[...],
                     preferred_element_type=jnp.float32) + bkv_ref[...]   # (S, 2d) f32
        k = kv[:, :d]
        v = kv[:, d:]
        kt_full = jnp.transpose(k).astype(jnp.bfloat16)                   # (d, S) bf16
        v_bf = v.astype(jnp.bfloat16)                                     # (S, d) bf16
        for h in range(nhead):
            kt_ref[h] = kt_full[h * dh:(h + 1) * dh, :]                   # (dh, S)
            v_ref[h] = v_bf[:, h * dh:(h + 1) * dh]                       # (S, dh)

    # ---- Q projection: one full-width (tq, d) @ (d, d) matmul (scale folded). ----
    q = jnp.dot(xq_b, wq_ref[...], preferred_element_type=jnp.float32) + bq_ref[...]
    q_b = q.astype(jnp.bfloat16)                                          # (tq, d) bf16

    # ---- per-head attention: plain MXU-shaped score / PV matmuls. Head outputs are
    #      written into a (tq, d) bf16 scratch so the o-projection runs full-width. ----
    for h in range(nhead):
        qh = q_b[:, h * dh:(h + 1) * dh]                                  # (tq, dh) bf16
        s = jnp.dot(qh, kt_ref[h], preferred_element_type=jnp.float32)    # (tq, S) f32
        s = s - jnp.max(s, axis=-1, keepdims=True)
        p = jnp.exp(s)
        p = p * pl.reciprocal(jnp.sum(p, axis=-1, keepdims=True), approx=True)
        oh = jnp.dot(p.astype(jnp.bfloat16), v_ref[h],
                     preferred_element_type=jnp.float32)                  # (tq, dh) f32
        oh_ref[:, h * dh:(h + 1) * dh] = oh.astype(jnp.bfloat16)

    # ---- output projection: one full-K (tq, d) @ (d, d) matmul. ----
    attn = jnp.dot(oh_ref[...], wo_ref[...],
                   preferred_element_type=jnp.float32) + bo_ref[...]      # (tq, d) f32

    # ---- residual + norm1 (post-norm), f32 statistics ----
    x1 = _layernorm(xq + attn, g1_ref[...], bt1_ref[...], eps)

    # ---- feed-forward: linear1 -> ReLU -> linear2 (bf16 MXU inputs, f32 acc) ----
    hdn = jnp.dot(x1.astype(jnp.bfloat16), w1_ref[...],
                  preferred_element_type=jnp.float32) + b1_ref[...]
    hdn = jnp.maximum(hdn, 0.0).astype(jnp.bfloat16)
    ff = jnp.dot(hdn, w2_ref[...],
                 preferred_element_type=jnp.float32) + b2_ref[...]

    # ---- residual + norm2 ----
    # Note: when S % tq != 0 the padded tail rows carry garbage, but every op here is
    # row-wise independent and the padded output rows are clipped by the out BlockSpec.
    o_ref[...] = _layernorm(x1 + ff, g2_ref[...], bt2_ref[...], eps).astype(o_ref.dtype)


# ----------------------------------------------------------------------------
# Host-side parameter prep: fused K/V weight, scale folding, bf16 weights.
# ----------------------------------------------------------------------------
def _prep_params(params, nhead):
    d = params["wq_t"].shape[0]
    dh = d // nhead
    scale = 1.0 / math.sqrt(dh)
    return dict(
        wq=(params["wq_t"] * scale).astype(jnp.bfloat16),                     # (d, d)
        bq=(params["bq"] * scale).astype(jnp.float32),                        # (1, d)
        wkv=jnp.concatenate([params["wk_t"], params["wv_t"]], axis=1
                            ).astype(jnp.bfloat16),                           # (d, 2d)
        bkv=jnp.concatenate([params["bk"], params["bv"]], axis=1
                            ).astype(jnp.float32),                            # (1, 2d)
        wo=params["wo_t"].astype(jnp.bfloat16),                               # (d, d)
        bo=params["bo"].astype(jnp.float32),
        w1=params["w1_t"].astype(jnp.bfloat16),
        b1=params["b1"].astype(jnp.float32),
        w2=params["w2_t"].astype(jnp.bfloat16),
        b2=params["b2"].astype(jnp.float32),
        g1=params["g1"].astype(jnp.float32),
        bt1=params["bt1"].astype(jnp.float32),
        g2=params["g2"].astype(jnp.float32),
        bt2=params["bt2"].astype(jnp.float32),
    )


# ----------------------------------------------------------------------------
# Wrapper
# ----------------------------------------------------------------------------
def transformer_encoder_layer(src, params, *, nhead, eps=1e-5, max_q_tile=None):
    """src: (S, B, d_model) float32 (batch_first=False, like the PyTorch module)."""
    S, B, d = src.shape
    assert d % nhead == 0, "d_model must be divisible by nhead"
    dh = d // nhead
    dff = params["w1_t"].shape[1]
    p = _prep_params(params, nhead)

    # ---- generation-aware VMEM budget ----
    try:
        phys_vmem = int(pltpu.get_tpu_info().vmem_capacity_bytes)
    except Exception:
        phys_vmem = 64 * 1024 * 1024          # conservative (v7x-sized) fallback
    cap = min(int(phys_vmem * 0.85), 100 * 1024 * 1024)

    r8 = lambda x: -(-x // 8) * 8
    r128 = lambda x: -(-x // 128) * 128
    S_p, d_p, dff_p, d2_p, dh_l = r128(S), r128(d), r128(dff), r128(2 * d), r128(dh)

    def _estimate_vmem(tq):
        # bf16 weights, double-buffered by the default pipeline
        w = 2 * 2 * (d * d_p + d * d2_p + d * d_p + d * dff_p + dff * d_p)
        # small f32 bias / norm rows (sublane-padded to 8), double-buffered
        pb = 2 * 4 * 8 * (6 * d_p + d2_p + dff_p)
        # activations: f32 query tile + bf16 full-seq + f32 out tile, double-buffered
        a = 2 * (4 * tq * d_p + 2 * r8(S) * d_p + 4 * tq * d_p)
        # scratches: K^T (nhead, dh, S_pad), V (nhead, S, dh_lane-padded), oh (tq, d) -- bf16
        sc = 2 * (nhead * r8(dh) * S_p + nhead * r8(S) * dh_l + tq * d_p)
        # transient f32 intermediates: KV proj, scores + probs, FFN hidden, ~6 (tq,d) temps
        it = 4 * (r8(S) * d2_p + 2 * tq * S_p + tq * dff_p + 6 * tq * d_p)
        return w + pb + a + sc + it

    # Query-tile size: full S when small; otherwise 512-row tiles on 128-MiB chips
    # (v5e/v6e), 256 on v7x -- multiples of 256 so matmuls map onto the 256-wide MXU.
    if max_q_tile is None:
        max_q_tile = 512 if phys_vmem >= 96 * 1024 * 1024 else 256
    tq = S if S <= max_q_tile else max_q_tile
    while tq > 128 and tq < S and _estimate_vmem(tq) > cap:
        tq //= 2
    nq = pl.cdiv(S, tq)
    vmem_limit = int(min(max(int(1.25 * _estimate_vmem(tq)), 32 * 1024 * 1024), cap))

    x_bsd = jnp.transpose(src, (1, 0, 2))                 # (B, S, d) f32 (residual / Q)
    x_bsd_bf16 = x_bsd.astype(jnp.bfloat16)               # (B, S, d) bf16 (K/V source only)

    const2 = lambda shape: pl.BlockSpec(shape, lambda b, i: (0, 0))

    kernel = functools.partial(_encoder_layer_kernel, nhead=nhead, dh=dh, eps=eps)

    out_bsd = pl.pallas_call(
        kernel,
        out_shape=jax.ShapeDtypeStruct((B, S, d), jnp.float32),
        grid=(B, nq),
        in_specs=[
            pl.BlockSpec((None, tq, d), lambda b, i: (b, i, 0)),   # x query tile (f32)
            pl.BlockSpec((None, S, d), lambda b, i: (b, 0, 0)),    # x full seq (bf16, K/V source)
            const2((d, d)),        # Wq (scale folded)
            const2((1, d)),        # bq (scale folded)
            const2((d, 2 * d)),    # [Wk | Wv] fused
            const2((1, 2 * d)),    # [bk | bv] fused
            const2((d, d)),        # Wo
            const2((1, d)),        # bo
            const2((d, dff)),      # W1
            const2((1, dff)),      # b1
            const2((dff, d)),      # W2
            const2((1, d)),        # b2
            const2((1, d)),        # norm1 gamma
            const2((1, d)),        # norm1 beta
            const2((1, d)),        # norm2 gamma
            const2((1, d)),        # norm2 beta
        ],
        out_specs=pl.BlockSpec((None, tq, d), lambda b, i: (b, i, 0)),
        scratch_shapes=[
            pltpu.VMEM((nhead, dh, S), jnp.bfloat16),   # K^T cache (lane-dense along S)
            pltpu.VMEM((nhead, S, dh), jnp.bfloat16),   # V cache
            pltpu.VMEM((tq, d), jnp.bfloat16),          # per-head attn-output concat buffer
        ],
        compiler_params=pltpu.CompilerParams(
            dimension_semantics=("parallel", "arbitrary"),
            vmem_limit_bytes=vmem_limit),
    )(x_bsd, x_bsd_bf16,
      p["wq"], p["bq"], p["wkv"], p["bkv"], p["wo"], p["bo"],
      p["w1"], p["b1"], p["w2"], p["b2"],
      p["g1"], p["bt1"], p["g2"], p["bt2"])

    return jnp.transpose(out_bsd, (1, 0, 2))              # back to (S, B, d)


# ----------------------------------------------------------------------------
# Pure-JAX f32 reference (mirrors PyTorch eval-mode forward) for verification.
# ----------------------------------------------------------------------------
def _reference(src, params, *, nhead, eps=1e-5):
    S, B, d = src.shape
    dh = d // nhead
    x = src

    def ln(y, g, b):
        mu = jnp.mean(y, axis=-1, keepdims=True)
        var = jnp.mean((y - mu) ** 2, axis=-1, keepdims=True)
        return (y - mu) / jnp.sqrt(var + eps) * g + b

    q = x @ params["wq_t"] + params["bq"]
    k = x @ params["wk_t"] + params["bk"]
    v = x @ params["wv_t"] + params["bv"]

    def split(t):  # (S,B,d) -> (B, H, S, dh)
        return jnp.transpose(t.reshape(S, B, nhead, dh), (1, 2, 0, 3))

    qh, kh, vh = split(q), split(k), split(v)
    s = jnp.einsum("bhsd,bhtd->bhst", qh, kh) / math.sqrt(dh)
    p = jax.nn.softmax(s, axis=-1)
    o = jnp.einsum("bhst,bhtd->bhsd", p, vh)
    o = jnp.transpose(o, (2, 0, 1, 3)).reshape(S, B, d)
    attn = o @ params["wo_t"] + params["bo"]

    x1 = ln(x + attn, params["g1"], params["bt1"])
    ff = jnp.maximum(x1 @ params["w1_t"] + params["b1"], 0.0) @ params["w2_t"] + params["b2"]
    return ln(x1 + ff, params["g2"], params["bt2"])


# ----------------------------------------------------------------------------
if __name__ == "__main__":
    S, B, D, NHEAD, DFF = 8, 2, 32, 4, 64

    key = jax.random.PRNGKey(0)
    keys = jax.random.split(key, 16)

    def u(k, shape, scale=0.1):
        return jax.random.uniform(k, shape, jnp.float32, -scale, scale)

    # PyTorch weights are (out, in); we store the transposed (in, out) matrices.
    params = {
        "wq_t": u(keys[0], (D, D)),
        "wk_t": u(keys[1], (D, D)),
        "wv_t": u(keys[2], (D, D)),
        "bq":   u(keys[3], (1, D)),
        "bk":   u(keys[4], (1, D)),
        "bv":   u(keys[5], (1, D)),
        "wo_t": u(keys[6], (D, D)),
        "bo":   u(keys[7], (1, D)),
        "w1_t": u(keys[8], (D, DFF)),
        "b1":   u(keys[9], (1, DFF)),
        "w2_t": u(keys[10], (DFF, D)),
        "b2":   u(keys[11], (1, D)),
        "g1":   jnp.ones((1, D), jnp.float32),
        "bt1":  jnp.zeros((1, D), jnp.float32),
        "g2":   jnp.ones((1, D), jnp.float32),
        "bt2":  jnp.zeros((1, D), jnp.float32),
    }

    src = jax.random.normal(keys[12], (S, B, D), jnp.float32)

    out = transformer_encoder_layer(src, params, nhead=NHEAD)
    out = jax.block_until_ready(out)

    ref = _reference(src, params, nhead=NHEAD)
    assert out.shape == (S, B, D)
    # bf16 matmul inputs + approx reciprocal -> compare vs f32 reference with loose tol.
    assert jnp.allclose(out, ref, atol=2e-2, rtol=2e-2), "mismatch vs reference"

    print("KERNEL_OK")
</pallas_src>

<mosaic_0001>
module attributes {stable_mosaic.version = 11 : i64} {
  func.func @_encoder_layer_kernel(%arg0: i32, %arg1: i32, %arg2: memref<1x8x32xf32, #tpu.memory_space<vmem>>, %arg3: memref<1x8x32xbf16, #tpu.memory_space<vmem>>, %arg4: memref<32x32xbf16, #tpu.memory_space<vmem>>, %arg5: memref<1x32xf32, #tpu.memory_space<vmem>>, %arg6: memref<32x64xbf16, #tpu.memory_space<vmem>>, %arg7: memref<1x64xf32, #tpu.memory_space<vmem>>, %arg8: memref<32x32xbf16, #tpu.memory_space<vmem>>, %arg9: memref<1x32xf32, #tpu.memory_space<vmem>>, %arg10: memref<32x64xbf16, #tpu.memory_space<vmem>>, %arg11: memref<1x64xf32, #tpu.memory_space<vmem>>, %arg12: memref<64x32xbf16, #tpu.memory_space<vmem>>, %arg13: memref<1x32xf32, #tpu.memory_space<vmem>>, %arg14: memref<1x32xf32, #tpu.memory_space<vmem>>, %arg15: memref<1x32xf32, #tpu.memory_space<vmem>>, %arg16: memref<1x32xf32, #tpu.memory_space<vmem>>, %arg17: memref<1x32xf32, #tpu.memory_space<vmem>>, %arg18: memref<1x8x32xf32, #tpu.memory_space<vmem>>, %arg19: memref<4x8x8xbf16, #tpu.memory_space<vmem>>, %arg20: memref<4x8x8xbf16, #tpu.memory_space<vmem>>, %arg21: memref<8x32xbf16, #tpu.memory_space<vmem>>) attributes {dimension_semantics = [#tpu.dimension_semantics<parallel>, #tpu.dimension_semantics<arbitrary>], iteration_bounds = array<i64: 2, 1>, scalar_prefetch = 0 : i64, scratch_operands = 3 : i64, tpu.core_type = #tpu.core_type<tc>, window_params = [{transform_indices = @transform_0, window_bounds = array<i64: 1, 8, 32>}, {transform_indices = @transform_1, window_bounds = array<i64: 1, 8, 32>}, {pipeline_mode = #tpu.pipeline_mode<synchronous>, transform_indices = @transform_2, window_bounds = array<i64: 32, 32>}, {pipeline_mode = #tpu.pipeline_mode<synchronous>, transform_indices = @transform_3, window_bounds = array<i64: 1, 32>}, {pipeline_mode = #tpu.pipeline_mode<synchronous>, transform_indices = @transform_4, window_bounds = array<i64: 32, 64>}, {pipeline_mode = #tpu.pipeline_mode<synchronous>, transform_indices = @transform_5, window_bounds = array<i64: 1, 64>}, {pipeline_mode = #tpu.pipeline_mode<synchronous>, transform_indices = @transform_6, window_bounds = array<i64: 32, 32>}, {pipeline_mode = #tpu.pipeline_mode<synchronous>, transform_indices = @transform_7, window_bounds = array<i64: 1, 32>}, {pipeline_mode = #tpu.pipeline_mode<synchronous>, transform_indices = @transform_8, window_bounds = array<i64: 32, 64>}, {pipeline_mode = #tpu.pipeline_mode<synchronous>, transform_indices = @transform_9, window_bounds = array<i64: 1, 64>}, {pipeline_mode = #tpu.pipeline_mode<synchronous>, transform_indices = @transform_10, window_bounds = array<i64: 64, 32>}, {pipeline_mode = #tpu.pipeline_mode<synchronous>, transform_indices = @transform_11, window_bounds = array<i64: 1, 32>}, {pipeline_mode = #tpu.pipeline_mode<synchronous>, transform_indices = @transform_12, window_bounds = array<i64: 1, 32>}, {pipeline_mode = #tpu.pipeline_mode<synchronous>, transform_indices = @transform_13, window_bounds = array<i64: 1, 32>}, {pipeline_mode = #tpu.pipeline_mode<synchronous>, transform_indices = @transform_14, window_bounds = array<i64: 1, 32>}, {pipeline_mode = #tpu.pipeline_mode<synchronous>, transform_indices = @transform_15, window_bounds = array<i64: 1, 32>}, {transform_indices = @transform_16, window_bounds = array<i64: 1, 8, 32>}]} {
    %c0 = arith.constant 0 : index
    %c0_0 = arith.constant 0 : index
    %c0_1 = arith.constant 0 : index
    %0 = vector.load %arg2[%c0, %c0_0, %c0_1] : memref<1x8x32xf32, #tpu.memory_space<vmem>>, vector<1x8x32xf32>
    %1 = vector.shape_cast %0 : vector<1x8x32xf32> to vector<8x32xf32>
    %2 = arith.truncf %1 : vector<8x32xf32> to vector<8x32xbf16>
    %c0_i32 = arith.constant 0 : i32
    %3 = arith.cmpi eq, %arg1, %c0_i32 : i32
    %4 = arith.extui %3 : i1 to i32
    %c0_i32_2 = arith.constant 0 : i32
    %5 = arith.cmpi ne, %4, %c0_i32_2 : i32
    scf.if %5 {
      %c0_88 = arith.constant 0 : index
      %c0_89 = arith.constant 0 : index
      %c0_90 = arith.constant 0 : index
      %165 = vector.load %arg3[%c0_88, %c0_89, %c0_90] : memref<1x8x32xbf16, #tpu.memory_space<vmem>>, vector<1x8x32xbf16>
      %166 = vector.shape_cast %165 : vector<1x8x32xbf16> to vector<8x32xbf16>
      %c0_91 = arith.constant 0 : index
      %c0_92 = arith.constant 0 : index
      %167 = vector.load %arg6[%c0_91, %c0_92] : memref<32x64xbf16, #tpu.memory_space<vmem>>, vector<32x64xbf16>
      %cst_93 = arith.constant dense<0.000000e+00> : vector<8x64xf32>
      %168 = tpu.matmul %166, %167, %cst_93 {dimension_numbers = #tpu.dot_dimension_numbers<[1], [0], [0], [1], [0, 0, 1, 1], [], []>} : vector<8x32xbf16>, vector<32x64xbf16>, vector<8x64xf32> -> vector<8x64xf32>
      %c0_94 = arith.constant 0 : index
      %c0_95 = arith.constant 0 : index
      %169 = vector.load %arg7[%c0_94, %c0_95] : memref<1x64xf32, #tpu.memory_space<vmem>>, vector<1x64xf32>
      %170 = vector.broadcast %169 : vector<1x64xf32> to vector<8x64xf32>
      %171 = arith.addf %168, %170 : vector<8x64xf32>
      %172 = vector.extract_strided_slice %171 {offsets = [0, 0], sizes = [8, 32], strides = [1, 1]} : vector<8x64xf32> to vector<8x32xf32>
      %173 = vector.extract_strided_slice %171 {offsets = [0, 32], sizes = [8, 32], strides = [1, 1]} : vector<8x64xf32> to vector<8x32xf32>
      %174 = tpu.transpose %172, [1, 0] : vector<8x32xf32> -> vector<32x8xf32>
      %175 = arith.truncf %174 : vector<32x8xf32> to vector<32x8xbf16>
      %176 = arith.truncf %173 : vector<8x32xf32> to vector<8x32xbf16>
      %177 = vector.extract_strided_slice %175 {offsets = [0, 0], sizes = [8, 8], strides = [1, 1]} : vector<32x8xbf16> to vector<8x8xbf16>
      %c0_96 = arith.constant 0 : index
      %c0_97 = arith.constant 0 : index
      %c0_98 = arith.constant 0 : index
      %178 = vector.load %arg19[%c0_96, %c0_97, %c0_98] : memref<4x8x8xbf16, #tpu.memory_space<vmem>>, vector<1x8x8xbf16>
      %179 = vector.shape_cast %178 : vector<1x8x8xbf16> to vector<8x8xbf16>
      %180 = vector.shape_cast %177 : vector<8x8xbf16> to vector<1x8x8xbf16>
      tpu.vector_store %arg19[%c0_96, %c0_97, %c0_98], %180 {strides = array<i32>} : memref<4x8x8xbf16, #tpu.memory_space<vmem>>, vector<1x8x8xbf16>,
      %181 = vector.extract_strided_slice %176 {offsets = [0, 0], sizes = [8, 8], strides = [1, 1]} : vector<8x32xbf16> to vector<8x8xbf16>
      %c0_99 = arith.constant 0 : index
      %c0_100 = arith.constant 0 : index
      %c0_101 = arith.constant 0 : index
      %182 = vector.load %arg20[%c0_99, %c0_100, %c0_101] : memref<4x8x8xbf16, #tpu.memory_space<vmem>>, vector<1x8x8xbf16>
      %183 = vector.shape_cast %182 : vector<1x8x8xbf16> to vector<8x8xbf16>
      %184 = vector.shape_cast %181 : vector<8x8xbf16> to vector<1x8x8xbf16>
      tpu.vector_store %arg20[%c0_99, %c0_100, %c0_101], %184 {strides = array<i32>} : memref<4x8x8xbf16, #tpu.memory_space<vmem>>, vector<1x8x8xbf16>,
      %185 = vector.extract_strided_slice %175 {offsets = [8, 0], sizes = [8, 8], strides = [1, 1]} : vector<32x8xbf16> to vector<8x8xbf16>
      %c1_102 = arith.constant 1 : index
      %c0_103 = arith.constant 0 : index
      %c0_104 = arith.constant 0 : index
      %186 = vector.load %arg19[%c1_102, %c0_103, %c0_104] : memref<4x8x8xbf16, #tpu.memory_space<vmem>>, vector<1x8x8xbf16>
      %187 = vector.shape_cast %186 : vector<1x8x8xbf16> to vector<8x8xbf16>
      %188 = vector.shape_cast %185 : vector<8x8xbf16> to vector<1x8x8xbf16>
      tpu.vector_store %arg19[%c1_102, %c0_103, %c0_104], %188 {strides = array<i32>} : memref<4x8x8xbf16, #tpu.memory_space<vmem>>, vector<1x8x8xbf16>,
      %189 = vector.extract_strided_slice %176 {offsets = [0, 8], sizes = [8, 8], strides = [1, 1]} : vector<8x32xbf16> to vector<8x8xbf16>
      %c1_105 = arith.constant 1 : index
      %c0_106 = arith.constant 0 : index
      %c0_107 = arith.constant 0 : index
      %190 = vector.load %arg20[%c1_105, %c0_106, %c0_107] : memref<4x8x8xbf16, #tpu.memory_space<vmem>>, vector<1x8x8xbf16>
      %191 = vector.shape_cast %190 : vector<1x8x8xbf16> to vector<8x8xbf16>
      %192 = vector.shape_cast %189 : vector<8x8xbf16> to vector<1x8x8xbf16>
      tpu.vector_store %arg20[%c1_105, %c0_106, %c0_107], %192 {strides = array<i32>} : memref<4x8x8xbf16, #tpu.memory_space<vmem>>, vector<1x8x8xbf16>,
      %193 = vector.extract_strided_slice %175 {offsets = [16, 0], sizes = [8, 8], strides = [1, 1]} : vector<32x8xbf16> to vector<8x8xbf16>
      %c2_108 = arith.constant 2 : index
      %c0_109 = arith.constant 0 : index
      %c0_110 = arith.constant 0 : index
      %194 = vector.load %arg19[%c2_108, %c0_109, %c0_110] : memref<4x8x8xbf16, #tpu.memory_space<vmem>>, vector<1x8x8xbf16>
      %195 = vector.shape_cast %194 : vector<1x8x8xbf16> to vector<8x8xbf16>
      %196 = vector.shape_cast %193 : vector<8x8xbf16> to vector<1x8x8xbf16>
      tpu.vector_store %arg19[%c2_108, %c0_109, %c0_110], %196 {strides = array<i32>} : memref<4x8x8xbf16, #tpu.memory_space<vmem>>, vector<1x8x8xbf16>,
      %197 = vector.extract_strided_slice %176 {offsets = [0, 16], sizes = [8, 8], strides = [1, 1]} : vector<8x32xbf16> to vector<8x8xbf16>
      %c2_111 = arith.constant 2 : index
      %c0_112 = arith.constant 0 : index
      %c0_113 = arith.constant 0 : index
      %198 = vector.load %arg20[%c2_111, %c0_112, %c0_113] : memref<4x8x8xbf16, #tpu.memory_space<vmem>>, vector<1x8x8xbf16>
      %199 = vector.shape_cast %198 : vector<1x8x8xbf16> to vector<8x8xbf16>
      %200 = vector.shape_cast %197 : vector<8x8xbf16> to vector<1x8x8xbf16>
      tpu.vector_store %arg20[%c2_111, %c0_112, %c0_113], %200 {strides = array<i32>} : memref<4x8x8xbf16, #tpu.memory_space<vmem>>, vector<1x8x8xbf16>,
      %201 = vector.extract_strided_slice %175 {offsets = [24, 0], sizes = [8, 8], strides = [1, 1]} : vector<32x8xbf16> to vector<8x8xbf16>
      %c3_114 = arith.constant 3 : index
      %c0_115 = arith.constant 0 : index
      %c0_116 = arith.constant 0 : index
      %202 = vector.load %arg19[%c3_114, %c0_115, %c0_116] : memref<4x8x8xbf16, #tpu.memory_space<vmem>>, vector<1x8x8xbf16>
      %203 = vector.shape_cast %202 : vector<1x8x8xbf16> to vector<8x8xbf16>
      %204 = vector.shape_cast %201 : vector<8x8xbf16> to vector<1x8x8xbf16>
      tpu.vector_store %arg19[%c3_114, %c0_115, %c0_116], %204 {strides = array<i32>} : memref<4x8x8xbf16, #tpu.memory_space<vmem>>, vector<1x8x8xbf16>,
      %205 = vector.extract_strided_slice %176 {offsets = [0, 24], sizes = [8, 8], strides = [1, 1]} : vector<8x32xbf16> to vector<8x8xbf16>
      %c3_117 = arith.constant 3 : index
      %c0_118 = arith.constant 0 : index
      %c0_119 = arith.constant 0 : index
      %206 = vector.load %arg20[%c3_117, %c0_118, %c0_119] : memref<4x8x8xbf16, #tpu.memory_space<vmem>>, vector<1x8x8xbf16>
      %207 = vector.shape_cast %206 : vector<1x8x8xbf16> to vector<8x8xbf16>
      %208 = vector.shape_cast %205 : vector<8x8xbf16> to vector<1x8x8xbf16>
      tpu.vector_store %arg20[%c3_117, %c0_118, %c0_119], %208 {strides = array<i32>} : memref<4x8x8xbf16, #tpu.memory_space<vmem>>, vector<1x8x8xbf16>,
    } else {
    }
    %c0_3 = arith.constant 0 : index
    %c0_4 = arith.constant 0 : index
    %6 = vector.load %arg4[%c0_3, %c0_4] : memref<32x32xbf16, #tpu.memory_space<vmem>>, vector<32x32xbf16>
    %cst = arith.constant dense<0.000000e+00> : vector<8x32xf32>
    %7 = tpu.matmul %2, %6, %cst {dimension_numbers = #tpu.dot_dimension_numbers<[1], [0], [0], [1], [0, 0, 1, 1], [], []>} : vector<8x32xbf16>, vector<32x32xbf16>, vector<8x32xf32> -> vector<8x32xf32>
    %c0_5 = arith.constant 0 : index
    %c0_6 = arith.constant 0 : index
    %8 = vector.load %arg5[%c0_5, %c0_6] : memref<1x32xf32, #tpu.memory_space<vmem>>, vector<1x32xf32>
    %9 = vector.broadcast %8 : vector<1x32xf32> to vector<8x32xf32>
    %10 = arith.addf %7, %9 : vector<8x32xf32>
    %11 = arith.truncf %10 : vector<8x32xf32> to vector<8x32xbf16>
    %12 = vector.extract_strided_slice %11 {offsets = [0, 0], sizes = [8, 8], strides = [1, 1]} : vector<8x32xbf16> to vector<8x8xbf16>
    %c0_7 = arith.constant 0 : index
    %c0_8 = arith.constant 0 : index
    %c0_9 = arith.constant 0 : index
    %13 = vector.load %arg19[%c0_7, %c0_8, %c0_9] : memref<4x8x8xbf16, #tpu.memory_space<vmem>>, vector<1x8x8xbf16>
    %14 = vector.shape_cast %13 : vector<1x8x8xbf16> to vector<8x8xbf16>
    %cst_10 = arith.constant dense<0.000000e+00> : vector<8x8xf32>
    %15 = tpu.matmul %12, %14, %cst_10 {dimension_numbers = #tpu.dot_dimension_numbers<[1], [0], [0], [1], [0, 0, 1, 1], [], []>} : vector<8x8xbf16>, vector<8x8xbf16>, vector<8x8xf32> -> vector<8x8xf32>
    %cst_11 = arith.constant dense<0xFF800000> : vector<8xf32>
    %16 = vector.multi_reduction <maximumf>, %15, %cst_11 [1] : vector<8x8xf32> to vector<8xf32>
    %17 = vector.shape_cast %16 : vector<8xf32> to vector<8x1xf32>
    %18 = vector.broadcast %17 : vector<8x1xf32> to vector<8x8xf32>
    %19 = arith.subf %15, %18 : vector<8x8xf32>
    %20 = math.exp %19 : vector<8x8xf32>
    %cst_12 = arith.constant dense<0.000000e+00> : vector<8xf32>
    %21 = vector.multi_reduction <add>, %20, %cst_12 [1] : vector<8x8xf32> to vector<8xf32>
    %22 = vector.shape_cast %21 : vector<8xf32> to vector<8x1xf32>
    %23 = tpu.reciprocal %22 {approx = true} : vector<8x1xf32> -> vector<8x1xf32>
    %24 = vector.broadcast %23 : vector<8x1xf32> to vector<8x8xf32>
    %25 = arith.mulf %20, %24 : vector<8x8xf32>
    %26 = arith.truncf %25 : vector<8x8xf32> to vector<8x8xbf16>
    %c0_13 = arith.constant 0 : index
    %c0_14 = arith.constant 0 : index
    %c0_15 = arith.constant 0 : index
    %27 = vector.load %arg20[%c0_13, %c0_14, %c0_15] : memref<4x8x8xbf16, #tpu.memory_space<vmem>>, vector<1x8x8xbf16>
    %28 = vector.shape_cast %27 : vector<1x8x8xbf16> to vector<8x8xbf16>
    %cst_16 = arith.constant dense<0.000000e+00> : vector<8x8xf32>
    %29 = tpu.matmul %26, %28, %cst_16 {dimension_numbers = #tpu.dot_dimension_numbers<[1], [0], [0], [1], [0, 0, 1, 1], [], []>} : vector<8x8xbf16>, vector<8x8xbf16>, vector<8x8xf32> -> vector<8x8xf32>
    %30 = arith.truncf %29 : vector<8x8xf32> to vector<8x8xbf16>
    %c0_17 = arith.constant 0 : index
    %c0_18 = arith.constant 0 : index
    %31 = vector.load %arg21[%c0_17, %c0_18] : memref<8x32xbf16, #tpu.memory_space<vmem>>, vector<8x8xbf16>
    tpu.vector_store %arg21[%c0_17, %c0_18], %30 {strides = array<i32>} : memref<8x32xbf16, #tpu.memory_space<vmem>>, vector<8x8xbf16>,
    %32 = vector.extract_strided_slice %11 {offsets = [0, 8], sizes = [8, 8], strides = [1, 1]} : vector<8x32xbf16> to vector<8x8xbf16>
    %c1 = arith.constant 1 : index
    %c0_19 = arith.constant 0 : index
    %c0_20 = arith.constant 0 : index
    %33 = vector.load %arg19[%c1, %c0_19, %c0_20] : memref<4x8x8xbf16, #tpu.memory_space<vmem>>, vector<1x8x8xbf16>
    %34 = vector.shape_cast %33 : vector<1x8x8xbf16> to vector<8x8xbf16>
    %cst_21 = arith.constant dense<0.000000e+00> : vector<8x8xf32>
    %35 = tpu.matmul %32, %34, %cst_21 {dimension_numbers = #tpu.dot_dimension_numbers<[1], [0], [0], [1], [0, 0, 1, 1], [], []>} : vector<8x8xbf16>, vector<8x8xbf16>, vector<8x8xf32> -> vector<8x8xf32>
    %cst_22 = arith.constant dense<0xFF800000> : vector<8xf32>
    %36 = vector.multi_reduction <maximumf>, %35, %cst_22 [1] : vector<8x8xf32> to vector<8xf32>
    %37 = vector.shape_cast %36 : vector<8xf32> to vector<8x1xf32>
    %38 = vector.broadcast %37 : vector<8x1xf32> to vector<8x8xf32>
    %39 = arith.subf %35, %38 : vector<8x8xf32>
    %40 = math.exp %39 : vector<8x8xf32>
    %cst_23 = arith.constant dense<0.000000e+00> : vector<8xf32>
    %41 = vector.multi_reduction <add>, %40, %cst_23 [1] : vector<8x8xf32> to vector<8xf32>
    %42 = vector.shape_cast %41 : vector<8xf32> to vector<8x1xf32>
    %43 = tpu.reciprocal %42 {approx = true} : vector<8x1xf32> -> vector<8x1xf32>
    %44 = vector.broadcast %43 : vector<8x1xf32> to vector<8x8xf32>
    %45 = arith.mulf %40, %44 : vector<8x8xf32>
    %46 = arith.truncf %45 : vector<8x8xf32> to vector<8x8xbf16>
    %c1_24 = arith.constant 1 : index
    %c0_25 = arith.constant 0 : index
    %c0_26 = arith.constant 0 : index
    %47 = vector.load %arg20[%c1_24, %c0_25, %c0_26] : memref<4x8x8xbf16, #tpu.memory_space<vmem>>, vector<1x8x8xbf16>
    %48 = vector.shape_cast %47 : vector<1x8x8xbf16> to vector<8x8xbf16>
    %cst_27 = arith.constant dense<0.000000e+00> : vector<8x8xf32>
    %49 = tpu.matmul %46, %48, %cst_27 {dimension_numbers = #tpu.dot_dimension_numbers<[1], [0], [0], [1], [0, 0, 1, 1], [], []>} : vector<8x8xbf16>, vector<8x8xbf16>, vector<8x8xf32> -> vector<8x8xf32>
    %50 = arith.truncf %49 : vector<8x8xf32> to vector<8x8xbf16>
    %c0_28 = arith.constant 0 : index
    %c8 = arith.constant 8 : index
    %51 = vector.load %arg21[%c0_28, %c8] : memref<8x32xbf16, #tpu.memory_space<vmem>>, vector<8x8xbf16>
    tpu.vector_store %arg21[%c0_28, %c8], %50 {strides = array<i32>} : memref<8x32xbf16, #tpu.memory_space<vmem>>, vector<8x8xbf16>,
    %52 = vector.extract_strided_slice %11 {offsets = [0, 16], sizes = [8, 8], strides = [1, 1]} : vector<8x32xbf16> to vector<8x8xbf16>
    %c2 = arith.constant 2 : index
    %c0_29 = arith.constant 0 : index
    %c0_30 = arith.constant 0 : index
    %53 = vector.load %arg19[%c2, %c0_29, %c0_30] : memref<4x8x8xbf16, #tpu.memory_space<vmem>>, vector<1x8x8xbf16>
    %54 = vector.shape_cast %53 : vector<1x8x8xbf16> to vector<8x8xbf16>
    %cst_31 = arith.constant dense<0.000000e+00> : vector<8x8xf32>
    %55 = tpu.matmul %52, %54, %cst_31 {dimension_numbers = #tpu.dot_dimension_numbers<[1], [0], [0], [1], [0, 0, 1, 1], [], []>} : vector<8x8xbf16>, vector<8x8xbf16>, vector<8x8xf32> -> vector<8x8xf32>
    %cst_32 = arith.constant dense<0xFF800000> : vector<8xf32>
    %56 = vector.multi_reduction <maximumf>, %55, %cst_32 [1] : vector<8x8xf32> to vector<8xf32>
    %57 = vector.shape_cast %56 : vector<8xf32> to vector<8x1xf32>
    %58 = vector.broadcast %57 : vector<8x1xf32> to vector<8x8xf32>
    %59 = arith.subf %55, %58 : vector<8x8xf32>
    %60 = math.exp %59 : vector<8x8xf32>
    %cst_33 = arith.constant dense<0.000000e+00> : vector<8xf32>
    %61 = vector.multi_reduction <add>, %60, %cst_33 [1] : vector<8x8xf32> to vector<8xf32>
    %62 = vector.shape_cast %61 : vector<8xf32> to vector<8x1xf32>
    %63 = tpu.reciprocal %62 {approx = true} : vector<8x1xf32> -> vector<8x1xf32>
    %64 = vector.broadcast %63 : vector<8x1xf32> to vector<8x8xf32>
    %65 = arith.mulf %60, %64 : vector<8x8xf32>
    %66 = arith.truncf %65 : vector<8x8xf32> to vector<8x8xbf16>
    %c2_34 = arith.constant 2 : index
    %c0_35 = arith.constant 0 : index
    %c0_36 = arith.constant 0 : index
    %67 = vector.load %arg20[%c2_34, %c0_35, %c0_36] : memref<4x8x8xbf16, #tpu.memory_space<vmem>>, vector<1x8x8xbf16>
    %68 = vector.shape_cast %67 : vector<1x8x8xbf16> to vector<8x8xbf16>
    %cst_37 = arith.constant dense<0.000000e+00> : vector<8x8xf32>
    %69 = tpu.matmul %66, %68, %cst_37 {dimension_numbers = #tpu.dot_dimension_numbers<[1], [0], [0], [1], [0, 0, 1, 1], [], []>} : vector<8x8xbf16>, vector<8x8xbf16>, vector<8x8xf32> -> vector<8x8xf32>
    %70 = arith.truncf %69 : vector<8x8xf32> to vector<8x8xbf16>
    %c0_38 = arith.constant 0 : index
    %c16 = arith.constant 16 : index
    %71 = vector.load %arg21[%c0_38, %c16] : memref<8x32xbf16, #tpu.memory_space<vmem>>, vector<8x8xbf16>
    tpu.vector_store %arg21[%c0_38, %c16], %70 {strides = array<i32>} : memref<8x32xbf16, #tpu.memory_space<vmem>>, vector<8x8xbf16>,
    %72 = vector.extract_strided_slice %11 {offsets = [0, 24], sizes = [8, 8], strides = [1, 1]} : vector<8x32xbf16> to vector<8x8xbf16>
    %c3 = arith.constant 3 : index
    %c0_39 = arith.constant 0 : index
    %c0_40 = arith.constant 0 : index
    %73 = vector.load %arg19[%c3, %c0_39, %c0_40] : memref<4x8x8xbf16, #tpu.memory_space<vmem>>, vector<1x8x8xbf16>
    %74 = vector.shape_cast %73 : vector<1x8x8xbf16> to vector<8x8xbf16>
    %cst_41 = arith.constant dense<0.000000e+00> : vector<8x8xf32>
    %75 = tpu.matmul %72, %74, %cst_41 {dimension_numbers = #tpu.dot_dimension_numbers<[1], [0], [0], [1], [0, 0, 1, 1], [], []>} : vector<8x8xbf16>, vector<8x8xbf16>, vector<8x8xf32> -> vector<8x8xf32>
    %cst_42 = arith.constant dense<0xFF800000> : vector<8xf32>
    %76 = vector.multi_reduction <maximumf>, %75, %cst_42 [1] : vector<8x8xf32> to vector<8xf32>
    %77 = vector.shape_cast %76 : vector<8xf32> to vector<8x1xf32>
    %78 = vector.broadcast %77 : vector<8x1xf32> to vector<8x8xf32>
    %79 = arith.subf %75, %78 : vector<8x8xf32>
    %80 = math.exp %79 : vector<8x8xf32>
    %cst_43 = arith.constant dense<0.000000e+00> : vector<8xf32>
    %81 = vector.multi_reduction <add>, %80, %cst_43 [1] : vector<8x8xf32> to vector<8xf32>
    %82 = vector.shape_cast %81 : vector<8xf32> to vector<8x1xf32>
    %83 = tpu.reciprocal %82 {approx = true} : vector<8x1xf32> -> vector<8x1xf32>
    %84 = vector.broadcast %83 : vector<8x1xf32> to vector<8x8xf32>
    %85 = arith.mulf %80, %84 : vector<8x8xf32>
    %86 = arith.truncf %85 : vector<8x8xf32> to vector<8x8xbf16>
    %c3_44 = arith.constant 3 : index
    %c0_45 = arith.constant 0 : index
    %c0_46 = arith.constant 0 : index
    %87 = vector.load %arg20[%c3_44, %c0_45, %c0_46] : memref<4x8x8xbf16, #tpu.memory_space<vmem>>, vector<1x8x8xbf16>
    %88 = vector.shape_cast %87 : vector<1x8x8xbf16> to vector<8x8xbf16>
    %cst_47 = arith.constant dense<0.000000e+00> : vector<8x8xf32>
    %89 = tpu.matmul %86, %88, %cst_47 {dimension_numbers = #tpu.dot_dimension_numbers<[1], [0], [0], [1], [0, 0, 1, 1], [], []>} : vector<8x8xbf16>, vector<8x8xbf16>, vector<8x8xf32> -> vector<8x8xf32>
    %90 = arith.truncf %89 : vector<8x8xf32> to vector<8x8xbf16>
    %c0_48 = arith.constant 0 : index
    %c24 = arith.constant 24 : index
    %91 = vector.load %arg21[%c0_48, %c24] : memref<8x32xbf16, #tpu.memory_space<vmem>>, vector<8x8xbf16>
    tpu.vector_store %arg21[%c0_48, %c24], %90 {strides = array<i32>} : memref<8x32xbf16, #tpu.memory_space<vmem>>, vector<8x8xbf16>,
    %c0_49 = arith.constant 0 : index
    %c0_50 = arith.constant 0 : index
    %92 = vector.load %arg21[%c0_49, %c0_50] : memref<8x32xbf16, #tpu.memory_space<vmem>>, vector<8x32xbf16>
    %c0_51 = arith.constant 0 : index
    %c0_52 = arith.constant 0 : index
    %93 = vector.load %arg8[%c0_51, %c0_52] : memref<32x32xbf16, #tpu.memory_space<vmem>>, vector<32x32xbf16>
    %cst_53 = arith.constant dense<0.000000e+00> : vector<8x32xf32>
    %94 = tpu.matmul %92, %93, %cst_53 {dimension_numbers = #tpu.dot_dimension_numbers<[1], [0], [0], [1], [0, 0, 1, 1], [], []>} : vector<8x32xbf16>, vector<32x32xbf16>, vector<8x32xf32> -> vector<8x32xf32>
    %c0_54 = arith.constant 0 : index
    %c0_55 = arith.constant 0 : index
    %95 = vector.load %arg9[%c0_54, %c0_55] : memref<1x32xf32, #tpu.memory_space<vmem>>, vector<1x32xf32>
    %96 = vector.broadcast %95 : vector<1x32xf32> to vector<8x32xf32>
    %97 = arith.addf %94, %96 : vector<8x32xf32>
    %98 = arith.addf %1, %97 : vector<8x32xf32>
    %c0_56 = arith.constant 0 : index
    %c0_57 = arith.constant 0 : index
    %99 = vector.load %arg14[%c0_56, %c0_57] : memref<1x32xf32, #tpu.memory_space<vmem>>, vector<1x32xf32>
    %c0_58 = arith.constant 0 : index
    %c0_59 = arith.constant 0 : index
    %100 = vector.load %arg15[%c0_58, %c0_59] : memref<1x32xf32, #tpu.memory_space<vmem>>, vector<1x32xf32>
    %cst_60 = arith.constant dense<0.000000e+00> : vector<8xf32>
    %101 = vector.multi_reduction <add>, %98, %cst_60 [1] : vector<8x32xf32> to vector<8xf32>
    %102 = vector.shape_cast %101 : vector<8xf32> to vector<8x1xf32>
    %cst_61 = arith.constant 3.200000e+01 : f32
    %103 = vector.broadcast %cst_61 : f32 to vector<8x1xf32>
    %104 = arith.divf %102, %103 : vector<8x1xf32>
    %105 = vector.broadcast %104 : vector<8x1xf32> to vector<8x32xf32>
    %106 = arith.subf %98, %105 : vector<8x32xf32>
    %107 = arith.mulf %106, %106 : vector<8x32xf32>
    %cst_62 = arith.constant dense<0.000000e+00> : vector<8xf32>
    %108 = vector.multi_reduction <add>, %107, %cst_62 [1] : vector<8x32xf32> to vector<8xf32>
    %109 = vector.shape_cast %108 : vector<8xf32> to vector<8x1xf32>
    %cst_63 = arith.constant 3.200000e+01 : f32
    %110 = vector.broadcast %cst_63 : f32 to vector<8x1xf32>
    %111 = arith.divf %109, %110 : vector<8x1xf32>
    %112 = vector.broadcast %104 : vector<8x1xf32> to vector<8x32xf32>
    %113 = arith.subf %98, %112 : vector<8x32xf32>
    %cst_64 = arith.constant 9.99999974E-6 : f32
    %114 = vector.broadcast %cst_64 : f32 to vector<8x1xf32>
    %115 = arith.addf %111, %114 : vector<8x1xf32>
    %116 = math.rsqrt %115 : vector<8x1xf32>
    %117 = vector.broadcast %116 : vector<8x1xf32> to vector<8x32xf32>
    %118 = arith.mulf %113, %117 : vector<8x32xf32>
    %119 = vector.broadcast %99 : vector<1x32xf32> to vector<8x32xf32>
    %120 = arith.mulf %118, %119 : vector<8x32xf32>
    %121 = vector.broadcast %100 : vector<1x32xf32> to vector<8x32xf32>
    %122 = arith.addf %120, %121 : vector<8x32xf32>
    %123 = arith.truncf %122 : vector<8x32xf32> to vector<8x32xbf16>
    %c0_65 = arith.constant 0 : index
    %c0_66 = arith.constant 0 : index
    %124 = vector.load %arg10[%c0_65, %c0_66] : memref<32x64xbf16, #tpu.memory_space<vmem>>, vector<32x64xbf16>
    %cst_67 = arith.constant dense<0.000000e+00> : vector<8x64xf32>
    %125 = tpu.matmul %123, %124, %cst_67 {dimension_numbers = #tpu.dot_dimension_numbers<[1], [0], [0], [1], [0, 0, 1, 1], [], []>} : vector<8x32xbf16>, vector<32x64xbf16>, vector<8x64xf32> -> vector<8x64xf32>
    %c0_68 = arith.constant 0 : index
    %c0_69 = arith.constant 0 : index
    %126 = vector.load %arg11[%c0_68, %c0_69] : memref<1x64xf32, #tpu.memory_space<vmem>>, vector<1x64xf32>
    %127 = vector.broadcast %126 : vector<1x64xf32> to vector<8x64xf32>
    %128 = arith.addf %125, %127 : vector<8x64xf32>
    %cst_70 = arith.constant 0.000000e+00 : f32
    %129 = vector.broadcast %cst_70 : f32 to vector<8x64xf32>
    %130 = arith.maximumf %128, %129 : vector<8x64xf32>
    %131 = arith.truncf %130 : vector<8x64xf32> to vector<8x64xbf16>
    %c0_71 = arith.constant 0 : index
    %c0_72 = arith.constant 0 : index
    %132 = vector.load %arg12[%c0_71, %c0_72] : memref<64x32xbf16, #tpu.memory_space<vmem>>, vector<64x32xbf16>
    %cst_73 = arith.constant dense<0.000000e+00> : vector<8x32xf32>
    %133 = tpu.matmul %131, %132, %cst_73 {dimension_numbers = #tpu.dot_dimension_numbers<[1], [0], [0], [1], [0, 0, 1, 1], [], []>} : vector<8x64xbf16>, vector<64x32xbf16>, vector<8x32xf32> -> vector<8x32xf32>
    %c0_74 = arith.constant 0 : index
    %c0_75 = arith.constant 0 : index
    %134 = vector.load %arg13[%c0_74, %c0_75] : memref<1x32xf32, #tpu.memory_space<vmem>>, vector<1x32xf32>
    %135 = vector.broadcast %134 : vector<1x32xf32> to vector<8x32xf32>
    %136 = arith.addf %133, %135 : vector<8x32xf32>
    %137 = arith.addf %122, %136 : vector<8x32xf32>
    %c0_76 = arith.constant 0 : index
    %c0_77 = arith.constant 0 : index
    %138 = vector.load %arg16[%c0_76, %c0_77] : memref<1x32xf32, #tpu.memory_space<vmem>>, vector<1x32xf32>
    %c0_78 = arith.constant 0 : index
    %c0_79 = arith.constant 0 : index
    %139 = vector.load %arg17[%c0_78, %c0_79] : memref<1x32xf32, #tpu.memory_space<vmem>>, vector<1x32xf32>
    %cst_80 = arith.constant dense<0.000000e+00> : vector<8xf32>
    %140 = vector.multi_reduction <add>, %137, %cst_80 [1] : vector<8x32xf32> to vector<8xf32>
    %141 = vector.shape_cast %140 : vector<8xf32> to vector<8x1xf32>
    %cst_81 = arith.constant 3.200000e+01 : f32
    %142 = vector.broadcast %cst_81 : f32 to vector<8x1xf32>
    %143 = arith.divf %141, %142 : vector<8x1xf32>
    %144 = vector.broadcast %143 : vector<8x1xf32> to vector<8x32xf32>
    %145 = arith.subf %137, %144 : vector<8x32xf32>
    %146 = arith.mulf %145, %145 : vector<8x32xf32>
    %cst_82 = arith.constant dense<0.000000e+00> : vector<8xf32>
    %147 = vector.multi_reduction <add>, %146, %cst_82 [1] : vector<8x32xf32> to vector<8xf32>
    %148 = vector.shape_cast %147 : vector<8xf32> to vector<8x1xf32>
    %cst_83 = arith.constant 3.200000e+01 : f32
    %149 = vector.broadcast %cst_83 : f32 to vector<8x1xf32>
    %150 = arith.divf %148, %149 : vector<8x1xf32>
    %151 = vector.broadcast %143 : vector<8x1xf32> to vector<8x32xf32>
    %152 = arith.subf %137, %151 : vector<8x32xf32>
    %cst_84 = arith.constant 9.99999974E-6 : f32
    %153 = vector.broadcast %cst_84 : f32 to vector<8x1xf32>
    %154 = arith.addf %150, %153 : vector<8x1xf32>
    %155 = math.rsqrt %154 : vector<8x1xf32>
    %156 = vector.broadcast %155 : vector<8x1xf32> to vector<8x32xf32>
    %157 = arith.mulf %152, %156 : vector<8x32xf32>
    %158 = vector.broadcast %138 : vector<1x32xf32> to vector<8x32xf32>
    %159 = arith.mulf %157, %158 : vector<8x32xf32>
    %160 = vector.broadcast %139 : vector<1x32xf32> to vector<8x32xf32>
    %161 = arith.addf %159, %160 : vector<8x32xf32>
    %c0_85 = arith.constant 0 : index
    %c0_86 = arith.constant 0 : index
    %c0_87 = arith.constant 0 : index
    %162 = vector.load %arg18[%c0_85, %c0_86, %c0_87] : memref<1x8x32xf32, #tpu.memory_space<vmem>>, vector<1x8x32xf32>
    %163 = vector.shape_cast %162 : vector<1x8x32xf32> to vector<8x32xf32>
    %164 = vector.shape_cast %161 : vector<8x32xf32> to vector<1x8x32xf32>
    tpu.vector_store %arg18[%c0_85, %c0_86, %c0_87], %164 {strides = array<i32>} : memref<1x8x32xf32, #tpu.memory_space<vmem>>, vector<1x8x32xf32>,
    return
  }
  func.func @transform_0(%arg0: i32, %arg1: i32) -> (i32, i32, i32) {
    %c0_i32 = arith.constant 0 : i32
    %c0_i32_0 = arith.constant 0 : i32
    return %arg0, %arg1, %c0_i32 : i32, i32, i32
  }
  func.func @transform_1(%arg0: i32, %arg1: i32) -> (i32, i32, i32) {
    %c0_i32 = arith.constant 0 : i32
    %c0_i32_0 = arith.constant 0 : i32
    %c0_i32_1 = arith.constant 0 : i32
    return %arg0, %c0_i32, %c0_i32_0 : i32, i32, i32
  }
  func.func @transform_2(%arg0: i32, %arg1: i32) -> (i32, i32) {
    %c0_i32 = arith.constant 0 : i32
    %c0_i32_0 = arith.constant 0 : i32
    %c0_i32_1 = arith.constant 0 : i32
    return %c0_i32, %c0_i32_0 : i32, i32
  }
  func.func @transform_3(%arg0: i32, %arg1: i32) -> (i32, i32) {
    %c0_i32 = arith.constant 0 : i32
    %c0_i32_0 = arith.constant 0 : i32
    %c0_i32_1 = arith.constant 0 : i32
    return %c0_i32, %c0_i32_0 : i32, i32
  }
  func.func @transform_4(%arg0: i32, %arg1: i32) -> (i32, i32) {
    %c0_i32 = arith.constant 0 : i32
    %c0_i32_0 = arith.constant 0 : i32
    %c0_i32_1 = arith.constant 0 : i32
    return %c0_i32, %c0_i32_0 : i32, i32
  }
  func.func @transform_5(%arg0: i32, %arg1: i32) -> (i32, i32) {
    %c0_i32 = arith.constant 0 : i32
    %c0_i32_0 = arith.constant 0 : i32
    %c0_i32_1 = arith.constant 0 : i32
    return %c0_i32, %c0_i32_0 : i32, i32
  }
  func.func @transform_6(%arg0: i32, %arg1: i32) -> (i32, i32) {
    %c0_i32 = arith.constant 0 : i32
    %c0_i32_0 = arith.constant 0 : i32
    %c0_i32_1 = arith.constant 0 : i32
    return %c0_i32, %c0_i32_0 : i32, i32
  }
  func.func @transform_7(%arg0: i32, %arg1: i32) -> (i32, i32) {
    %c0_i32 = arith.constant 0 : i32
    %c0_i32_0 = arith.constant 0 : i32
    %c0_i32_1 = arith.constant 0 : i32
    return %c0_i32, %c0_i32_0 : i32, i32
  }
  func.func @transform_8(%arg0: i32, %arg1: i32) -> (i32, i32) {
    %c0_i32 = arith.constant 0 : i32
    %c0_i32_0 = arith.constant 0 : i32
    %c0_i32_1 = arith.constant 0 : i32
    return %c0_i32, %c0_i32_0 : i32, i32
  }
  func.func @transform_9(%arg0: i32, %arg1: i32) -> (i32, i32) {
    %c0_i32 = arith.constant 0 : i32
    %c0_i32_0 = arith.constant 0 : i32
    %c0_i32_1 = arith.constant 0 : i32
    return %c0_i32, %c0_i32_0 : i32, i32
  }
  func.func @transform_10(%arg0: i32, %arg1: i32) -> (i32, i32) {
    %c0_i32 = arith.constant 0 : i32
    %c0_i32_0 = arith.constant 0 : i32
    %c0_i32_1 = arith.constant 0 : i32
    return %c0_i32, %c0_i32_0 : i32, i32
  }
  func.func @transform_11(%arg0: i32, %arg1: i32) -> (i32, i32) {
    %c0_i32 = arith.constant 0 : i32
    %c0_i32_0 = arith.constant 0 : i32
    %c0_i32_1 = arith.constant 0 : i32
    return %c0_i32, %c0_i32_0 : i32, i32
  }
  func.func @transform_12(%arg0: i32, %arg1: i32) -> (i32, i32) {
    %c0_i32 = arith.constant 0 : i32
    %c0_i32_0 = arith.constant 0 : i32
    %c0_i32_1 = arith.constant 0 : i32
    return %c0_i32, %c0_i32_0 : i32, i32
  }
  func.func @transform_13(%arg0: i32, %arg1: i32) -> (i32, i32) {
    %c0_i32 = arith.constant 0 : i32
    %c0_i32_0 = arith.constant 0 : i32
    %c0_i32_1 = arith.constant 0 : i32
    return %c0_i32, %c0_i32_0 : i32, i32
  }
  func.func @transform_14(%arg0: i32, %arg1: i32) -> (i32, i32) {
    %c0_i32 = arith.constant 0 : i32
    %c0_i32_0 = arith.constant 0 : i32
    %c0_i32_1 = arith.constant 0 : i32
    return %c0_i32, %c0_i32_0 : i32, i32
  }
  func.func @transform_15(%arg0: i32, %arg1: i32) -> (i32, i32) {
    %c0_i32 = arith.constant 0 : i32
    %c0_i32_0 = arith.constant 0 : i32
    %c0_i32_1 = arith.constant 0 : i32
    return %c0_i32, %c0_i32_0 : i32, i32
  }
  func.func @transform_16(%arg0: i32, %arg1: i32) -> (i32, i32, i32) {
    %c0_i32 = arith.constant 0 : i32
    %c0_i32_0 = arith.constant 0 : i32
    return %arg0, %arg1, %c0_i32 : i32, i32, i32
  }
}

</mosaic_0001>

<bundles_post_ra>
// kernel: tpu_custom_call.1
= control target key start
LH: loop header
LB: loop body
LE: loop exit
PB: predicated region body
PF: predicated region fallthrough
CT: control target
= control target key end

     0   :  { %s2760_s0 = inlined_call_operand.vmem [shape: f32[2,8,32], index: 0, kind: input, shape index: {}]   ;;  %s2761_s1 = inlined_call_operand.hbm [shape: bf16[2,8,32], index: 1, kind: input, shape index: {}]   ;;  %s2762_s2 = inlined_call_operand.vmem [shape: bf16[32,32], index: 2, kind: input, shape index: {}]   ;;  %s2763_s3 = inlined_call_operand.vmem [shape: f32[1,32], index: 3, kind: input, shape index: {}]   ;;  %s2764_s4 = inlined_call_operand.vmem [shape: bf16[32,64], index: 4, kind: input, shape index: {}]   ;;  %s2765_s5 = inlined_call_operand.vmem [shape: f32[1,64], index: 5, kind: input, shape index: {}]   ;;  %s2766_s6 = inlined_call_operand.hbm [shape: bf16[32,32], index: 6, kind: input, shape index: {}]   ;;  %s2767_s7 = inlined_call_operand.hbm [shape: f32[1,32], index: 7, kind: input, shape index: {}]   ;;  %s2768_s8 = inlined_call_operand.hbm [shape: bf16[32,64], index: 8, kind: input, shape index: {}]   ;;  %s2769_s9 = inlined_call_operand.hbm [shape: f32[1,64], index: 9, kind: input, shape index: {}]   ;;  %s2770_s10 = inlined_call_operand.vmem [shape: bf16[64,32], index: 10, kind: input, shape index: {}]   ;;  %s2771_s11 = inlined_call_operand.vmem [shape: f32[1,32], index: 11, kind: input, shape index: {}]   ;;  %s2772_s12 = inlined_call_operand.vmem [shape: f32[1,32], index: 12, kind: input, shape index: {}]   ;;  %s2773_s13 = inlined_call_operand.vmem [shape: f32[1,32], index: 13, kind: input, shape index: {}]   ;;  %s2774_s14 = inlined_call_operand.vmem [shape: f32[1,32], index: 14, kind: input, shape index: {}]   ;;  %s2775_s15 = inlined_call_operand.vmem [shape: f32[1,32], index: 15, kind: input, shape index: {}]   ;;  %s2776_s16 = inlined_call_operand.hbm [shape: f32[2,8,32], index: 16, kind: output, shape index: {}]  }
   0x1   :  { %2782 = sst [smem:[#allocation23_spill]] %s2760_s0 }
   0x2   :  { %2783 = sst [smem:[#allocation24_spill]] %s2766_s6 }
   0x3   :  { %2784 = sst [smem:[#allocation25_spill]] %s2767_s7 }
   0x4   :  { %2785 = sst [smem:[#allocation26_spill]] %s2768_s8 }
   0x5   :  { %2786 = sst [smem:[#allocation27_spill]] %s2769_s9 }
   0x6   :  { %2787 = sst [smem:[#allocation28_spill]] %s2771_s11 }
   0x7   :  { %2788 = sst [smem:[#allocation29_spill]] %s2774_s14 }
   0x8   :  { %2789 = sst [smem:[#allocation30_spill]] %s2775_s15 }
   0x9   :  { %2790 = sst [smem:[#allocation31_spill]] %s2776_s16 }
   0xa   :  { %21 = vsyncpa [#allocation6], 0 }
   0xb   :  { %23 = vsyncpa [#allocation6 + $0x1], 0 }
   0xc   :  { %24 = vsyncpa [#allocation9], 0 }
   0xd   :  { %25 = vsyncpa [#allocation12], 0 }
   0xe   :  { %26 = vsyncpa [#allocation7], 0 }
   0xf   :  { %28 = vsyncpa [#allocation7 + $0x1], 0  ;;  %s2415_s21 = smov 0   ;;  %s2417_s22 = smov 0  }
  0x10   :  { %s2419_s23 = smov 0   ;;  %s2421_s24 = smov 0  }
  0x11   :  { %s2423_s25 = smov 0   ;;  %s2425_s26 = smov 0  }
  0x12 LB: > { %2791 = sst [smem:[#allocation19_spill]] %s2288_s21  ;;  %s2777_s27 = sadd.s32 4294967295, %s2308_s26   ;;  %s2308_s26 = sphi %s2425_s26, %s34_s26   ;;  %s2304_s25 = sphi %s2423_s25, %s2818_s25   ;;  %s2300_s24 = sphi %s2421_s24, %s2817_s24   ;;  %s2296_s23 = sphi %s2419_s23, %s2821_s23   ;;  %s2292_s22 = sphi %s2417_s22, %s2820_s22   ;;  %s2288_s21 = sphi %s2415_s21, %s2819_s21  }
  0x13   : > { %2792 = sst [smem:[#allocation20_spill]] %s2304_s25  ;;  %p1748_p0 = scmp.ge.s32.totalorder %s2308_s26, 1 }
  0x14   : > { %p2449_p1 = scmp.eq.s32.totalorder %s2777_s27, 0  ;;  %p427_p2 = scmp.lt.s32.totalorder %s2308_s26, 3 }
  0x15   : > { %s2310_s30 = smov [#allocation8]   ;;  %s2311_s18 = smov [#allocation11]  }
  0x16   : > { %p2454_p3 = pnand %p1748_p0, %p427_p2  ;;  %s451_s0 = sshll.u32 %s2310_s30, 4  ;;  %s452_s0 = int_to_ptr.vmem [resolvable:$true] %s451_s0 }
  0x17   : > { %s475_s19 = sshll.u32 %s2311_s18, 4  ;;  %s2312_s20 = smov [#allocation10]   ;;  %s476_s19 = int_to_ptr.vmem [resolvable:$true] %s475_s19 }
  0x18   : > { %p1959_p4 = pneg %p2454_p3  ;;  %s465_s27 = sshll.u32 %s2312_s20, 4  ;;  %s466_s27 = int_to_ptr.vmem [resolvable:$true] %s465_s27 }
  0x19   : > { %s2099_s16 = scalar_lea.vmem %s452_s0, 256  ;;  %p2107_p11 = scmp.lt.s32.totalorder %s452_s0, %s452_s0 }
  0x1a   : > { %p2463_p6 = pnand %p1959_p4, %p2449_p1  ;;  %p2100_p8 = scmp.ne.s32.totalorder %s452_s0, %s2099_s16 }
  0x1b   : > { %p2108_p12 = scmp.lt.s32.totalorder %s2099_s16, %s2099_s16 }
  0x1c   : > { %p2090_p7 = pneg %p2463_p6 }
  0x1d   : > { %p2109_p13 = por %p2108_p12, %p2107_p11 }
  0x1e   : > { %p2102_p9 = pnand %p2100_p8, %p2090_p7 }
  0x20   : > { %p2103_p10 = pneg %p2102_p9 }
  0x22   : > { %p2110_p0 = pnand %p2109_p13, %p2103_p10 }
  0x24   : > { %2113 = shalt.err (!%p2110_p0)
}
  0x25   : > { %s2313_s30 = smov 64   ;;  %s2314_s18 = smov 4  }
  0x26   : > { %s2796_s6 = sld [smem:[#allocation24_spill]]  ;;  %s2125_s14 = scalar_lea.vmem %s476_s19, 256 }
  0x27   : > { %p2126_p2 = scmp.ne.s32.totalorder %s476_s19, %s2125_s14  ;;  %p2133_p9 = scmp.lt.s32.totalorder %s476_s19, %s476_s19 }
  0x28   : > { %p2134_p5 = scmp.lt.s32.totalorder %s2125_s14, %s2125_s14 }
  0x29   : > { %p2128_p4 = pnand %p2126_p2, %p2090_p7 }
  0x2a   : > { %p2135_p11 = por %p2134_p5, %p2133_p9 }
  0x2b   : > { %p2129_p8 = pneg %p2128_p4 }
  0x2c   : > { %1962 = dma.hbm_to_vmem [thread:$0]  (!%p2463_p6), %s2796_s6, 256, %s452_s0, [#allocation9], %s2313_s30, %s2313_s30, %s2314_s18  }
  0x2d   : > { %p2136_p10 = pnand %p2135_p11, %p2129_p8 }
  0x2f   : > { %2139 = shalt.err (!%p2136_p10)
}
  0x30   : > { %s2797_s8 = sld [smem:[#allocation26_spill]]  ;;  %s2151_s15 = scalar_lea.vmem %s466_s27, 16 }
  0x31   : > { %p2152_p12 = scmp.ne.s32.totalorder %s466_s27, %s2151_s15  ;;  %s2158_s0 = scalar_lea.vmem %s466_s27, 32 }
  0x32   : > { %p2159_p2 = scmp.lt.s32.totalorder %s466_s27, %s466_s27  ;;  %p2160_p4 = scmp.lt.s32.totalorder %s2158_s0, %s2151_s15 }
  0x33   : > { %p2154_p13 = pnand %p2152_p12, %p2090_p7 }
  0x34   : > { %p2161_p5 = por %p2160_p4, %p2159_p2 }
  0x35   : > { %p2155_p0 = pneg %p2154_p13 }
  0x36   : > { %1968 = dma.hbm_to_vmem [thread:$0]  (!%p2463_p6), %s2797_s8, 256, %s476_s19, [#allocation12], %s2313_s30, %s2313_s30, %s2314_s18  }
  0x37   : > { %p2162_p8 = pnand %p2161_p5, %p2155_p0 }
  0x39   : > { %2165 = shalt.err (!%p2162_p8)
}
  0x3a   : > { %s2798_s7 = sld [smem:[#allocation25_spill]]  ;;  %s2315_s11 = smov [#allocation13]  }
  0x3b   : > { %s489_s19 = sshll.u32 %s2315_s11, 4  ;;  %s490_s19 = int_to_ptr.vmem [resolvable:$true] %s489_s19 }
  0x3c   : > { %s2177_s30 = scalar_lea.vmem %s490_s19, 16  ;;  %s2184_s18 = scalar_lea.vmem %s490_s19, 32 }
  0x3d   : > { %p2178_p9 = scmp.ne.s32.totalorder %s490_s19, %s2177_s30  ;;  %p2185_p12 = scmp.lt.s32.totalorder %s490_s19, %s490_s19 }
  0x3e   : > { %p2186_p13 = scmp.lt.s32.totalorder %s2184_s18, %s2177_s30 }
  0x3f   : > { %p2180_p11 = pnand %p2178_p9, %p2090_p7 }
  0x40   : > { %1965 = dma.hbm_to_vmem [thread:$0]  (!%p2463_p6), %s2798_s7, 16, %s466_s27, [#allocation9]  }
  0x41   : > { %p2181_p10 = pneg %p2180_p11  ;;  %p2187_p0 = por %p2186_p13, %p2185_p12 }
  0x43   : > { %p2188_p2 = pnand %p2187_p0, %p2181_p10 }
  0x45   : > { %2191 = shalt.err (!%p2188_p2)
}
  0x46   : > { %s2799_s9 = sld [smem:[#allocation27_spill]]  ;;  %s1747_s27 = sadd.s32 4294967294, %s2308_s26  }
  0x47   : > { %s46_s0 = sadd.s32 1, %s2304_s25  ;;  %s81_s17 = sadd.s32 1, %s2296_s23 }
  0x48   : > { %p48_p7 = scmp.ge.s32.totalorder %s46_s0, 2  ;;  %p88_p4 = scmp.ne.s32.totalorder %s2296_s23, %s2292_s22 }
  0x49   : > { %p89_p5 = scmp.eq.s32.totalorder %s2308_s26, 0  ;;  %p94_p9 = scmp.ne.s32.totalorder %s2292_s22, %s2288_s21 }
  0x4a   : > { %s2823_s0 = smov (%p48_p7, %s46_s0), 0  ;;  %s2802_s11 = sadd.s32 4294967295, %s2308_s26  }
  0x4b   : > { %2800 = sst [smem:[#allocation21_spill]] %s2823_s0  ;;  %p2509_p8 = por %p89_p5, %p88_p4 }
  0x4c   : > { %1971 = dma.hbm_to_vmem [thread:$0]  (!%p2463_p6), %s2799_s9, 16, %s490_s19, [#allocation12]  }
  0x4d   : > { %s78_s20 = ssub.s32 %s2304_s25, %s2823_s0  ;;  %p414_p6 = scmp.eq.s32.totalorder %s2802_s11, 1 }
  0x4e   : > { %p79_p11 = scmp.eq.s32.totalorder %s78_s20, 0  ;;  %p2521_p10 = por %p2449_p1, %p94_p9 }
  0x4f   : > { %p2525_p12 = por %p414_p6, %p88_p4  ;;  %p420_p13 = scmp.eq.s32.totalorder %s1747_s27, 1 }
  0x50   : > { %s2530_s18 = scalar_select %p79_p11, %s2296_s23, %s81_s17  }
  0x51   : > { %p2532_p0 = por %p420_p13, %p94_p9  ;;  %p1984_p2 = scmp.lt.s32.totalorder %s2308_s26, 2 }
  0x52   : > { %2805 = sst [smem:[#allocation22_spill]] %s2530_s18  ;;  %s528_s15 = sand.u32 1, %s2296_s23  }
  0x53   : > { %s2806_s16 = scalar_select %p2532_p0, 1, 0 }
  0x54   : > { %s1755_s11 = sshll.u32 %s2304_s25, 6  ;;  %s1754_s20 = sshll.u32 %s528_s15, 2 }
  0x55   : > { %s537_s8 = scalar_lea.hbm %s2761_s1, %s1755_s11  ;;  %s532_s9 = scalar_lea.vmem [#allocation5], %s1754_s20 }
  0x56   : > { %s539_s0 = sshll.u32 %s532_s9, 4  ;;  %p2544_p7 = pnand %p1984_p2, %p2509_p8  ;;  %s540_s0 = int_to_ptr.vmem [resolvable:$true] %s539_s0 }
  0x57   : > { %s529_s27 = scalar_lea.sflag [#allocation6], %s528_s15  ;;  %s2205_s17 = scalar_lea.vmem %s540_s0, 64 }
  0x58   : > { %p2194_p4 = pneg %p2544_p7  ;;  %p2206_p5 = scmp.ne.s32.totalorder %s540_s0, %s2205_s17 }
  0x59   : > { %s2316_s25 = smov [#allocation5]  }
  0x5a   : > { %p2208_p9 = pnand %p2206_p5, %p2194_p4  ;;  %s2210_s18 = sshll.u32 %s2316_s25, 4  ;;  %s2211_s18 = int_to_ptr.vmem [resolvable:$false] %s2210_s18 }
  0x5b   : > { %s2212_s6 = scalar_lea.vmem %s2211_s18, 128  ;;  %p2213_p11 = scmp.lt.s32.totalorder %s540_s0, %s2211_s18 }
  0x5c   : > { %p2209_p6 = pneg %p2208_p9  ;;  %p2214_p13 = scmp.lt.s32.totalorder %s2212_s6, %s2205_s17 }
  0x5e   : > { %p2215_p0 = por %p2214_p13, %p2213_p11 }
  0x60   : > { %p2216_p8 = pnand %p2215_p0, %p2209_p6 }
  0x62   : > { %2219 = shalt.err (!%p2216_p8)
}
  0x63   : > { %1975 = dma.hbm_to_vmem [thread:$0]  (!%p2544_p7), %s537_s8, 64, %s540_s0, %s529_s27  }
  0x64   : > { %548 = sbr.rel (%p2454_p3) target bundleno = 2616 (0xa38), region = 84  ;;  %s2555_s7 = sand.u32 (!%p2454_p3), 1, %s2292_s22  }
  0x65   : > { %s1757_s9 = sshll.u32 (!%p2454_p3), %s2555_s7, 2  ;;  %s551_s25 = scalar_lea.sflag (!%p2454_p3), [#allocation6], %s2555_s7 }
  0x66   : > { %s554_s14 = scalar_lea.vmem (!%p2454_p3), [#allocation5], %s1757_s9 }
  0x69   : > { %2271 = dma.done.wait (%p2521_p10), %s551_s25, 64  }
  0x6a   : > { %2273 = vsyncadd (%p2521_p10), %s551_s25, 4294967232 }
  0x6b   : > { %2275 = dma.done.wait (%p2449_p1), [#allocation9], 272  }
  0x6c   : > { %2277 = vsyncadd (%p2449_p1), [#allocation9], 4294967024 }
  0x6d   : > { %2279 = dma.done.wait (%p2449_p1), [#allocation12], 272  }
  0x6e   : > { %2281 = vsyncadd (%p2449_p1), [#allocation12], 4294967024  ;;  %v2317_v0 = vmov 0.0   ;;  %vm2318_vm0 = vmmov 0   ;;  %p626_p3 = scmp.lt.s32.totalorder %s2300_s24, 1  ;;  %v2056_v1 = vld [vmem:[%s2764_s4 + $0x8] sm:$0xff]  }
  0x6f   : > { %1847 = vmatprep.subr.bf16.mxu1 %v2317_v0  ;;  %1851 = vmatprep.mubr.msk.bf16.mxu1 %vm2318_vm0, %v2317_v0  ;;  %v2057_v2 = vld [vmem:[%s2764_s4] sm:$0xff]   ;;  %vm664_vm1 = vcmask 261120   ;;  %v2058_v4 = vld [vmem:[%s2762_s2 + $0x8] sm:$0xff]   ;;  %s2808_s27 = sld [smem:[#allocation23_spill]]  ;;  %s2319_s8 = smov 112   ;;  %vm743_vm2 = vcmask 60416  }
  0x70   : > { %1863 = vmatprep.subr.bf16.mxu0 %v2317_v0  ;;  %1865 = vmatprep.mubr.msk.bf16.mxu0 %vm2318_vm0, %v2317_v0  ;;  %s627_s28 = scalar_select %p626_p3, %s2300_s24, 1  ;;  %v640_v3 = vld [vmem:[%s554_s14] sm:$0xf]  ;;  %v1771_v12 = vld [vmem:[%s2763_s3] ss:$0 sm:$0xff]  ;;  %vm854_vm3 = vcmask 1043456  }
  0x71   : > { %1848 = vmatpush3.bf16.msra.mxu1 %v2056_v1  ;;  %v2059_v5 = vld [vmem:[%s2762_s2] sm:$0xff]   ;;  %s2320_s21 = smov 120   ;;  %vm850_vm4 = vcmask 64512   ;;  %s2322_s19 = smov 88   ;;  %vm1078_vm5 = vcmask 126016   ;;  %vm1197_vm6 = vcmask 191616  }
  0x72   : > { %1849 = vmatprep.subr.bf16.mxu1 %v2317_v0  ;;  %s1763_s15 = sshll.u32 %s627_s28, 3  ;;  %s2321_s28 = smov 104   ;;  %v1764_v19 = vld [vmem:[%s2765_s5] ss:$0 sm:$0xff]  ;;  %vm1316_vm7 = vcmask 257216   ;;  %vm1524_vm8 = vcmask 523264  }
  0x73   : > { %s2323_s18 = smov 80   ;;  %s2325_s11 = smov 96  }
  0x74   : > { %s2326_s20 = smov 8   ;;  %s2810_s25 = sld [smem:[#allocation29_spill]] }
  0x75   : > { %1850 = vmatpush3.bf16.msra.mxu1 %v2057_v2  ;;  %s632_s17 = scalar_lea.vmem %s2808_s27, %s1763_s15  ;;  %s2324_s15 = smov 72  }
  0x76   : > { %1855 = vmatprep.subr.bf16.mxu1 %v2317_v0  ;;  %v2599_v6 = vld [vmem:[%s632_s17] sm:$0xff]  ;;  %s2327_s27 = smov 16   ;;  %s2328_s17 = smov 24  }
  0x77   : > { %v635_v7 = vpack.c.bf16 %v2599_v6, %v2599_v6  ;;  %s2329_s6 = smov [#allocation14]  }
  0x78   : > { %1852 = vmatmul.mubr.msk.bf16.vlgmr.msra.gmra.mxu1 %vm664_vm1, %v640_v3  ;;  %s2224_s9 = sshll.u32 %s2329_s6, 4  ;;  %s2225_s9 = int_to_ptr.vmem [resolvable:$false] %s2224_s9 }
  0x79   : > { %1856 = vmatpush3.bf16.msra.mxu1 %v2058_v4  ;;  %1859 = vmatprep.mubr.msk.bf16.mxu1 %vm2318_vm0, %v2317_v0 }
  0x7a   : > { %1857 = vmatprep.subr.bf16.mxu1 %v2317_v0 }
  0x7d   : > { %1858 = vmatpush3.bf16.msra.mxu1 %v2059_v5 }
  0x7e   : > { %1869 = vmatprep.subr.bf16.mxu1 %v2317_v0 }
  0x80   : > { %1860 = vmatmul.mubr.msk.bf16.vlgmr.msra.gmra.mxu1 %vm664_vm1, %v635_v7 }
  0x81   : > { %1871 = vmatprep.mubr.msk.bf16.mxu1 %vm2318_vm0, %v2317_v0 }
 0x138   : > { %v702_v8 = vpop.f32.mrf.mxu1 }
 0x139   : > { %v2614_v20 = vadd.f32 %v1764_v19, %v702_v8 }
 0x13a   : > { %v1853_v9 = vpop.f32.mrf.mxu1 }
 0x13b   : > { %v1808_v59 = vpack.c.bf16 %v2614_v20, %v2614_v20 }
 0x13c   : > { %v705_v10 = vpop.f32.mrf.mxu1 }
 0x13e   : > { %v1854_v11 = vpop.f32.mrf.mxu1 }
 0x140   : > { %v842_v13 = vpop.f32.mrf.mxu1 }
 0x141   : > { %v843_v14 = vadd.f32 %v1771_v12, %v842_v13 }
 0x142   : > { %v1861_v15 = vpop.f32.mrf.mxu1 }
 0x143   : > { %v848_v16 = vpack.c.bf16 %v843_v14, %v843_v14 }
 0x144   : > { %v845_v17 = vpop.f32.mrf.mxu1 }
 0x145   : > { %1082 = vrot.lane.b32.xlu1 %v848_v16, %s2319_s8  ;;  %963 = vrot.lane.b32.xlu0 %v848_v16, %s2320_s21  ;;  %s2811_s21 = sld [smem:[#allocation30_spill]] }
 0x146   : > { %v1862_v18 = vpop.f32.mrf.mxu1 }
 0x149   : > { %1201 = vrot.lane.b32.xlu1 %v848_v16, %s2321_s28  ;;  %s1805_s28 = sshll.u32 %s2300_s24, 7  ;;  %s2226_s24 = scalar_lea.vmem %s2225_s9, 256 }
 0x163   : > { %708 = vxpose.xlu0.b32.start.end [1/1] (short) (narrow) %v2614_v20, 32 }
 0x1b7   : > { %v964_v21 = vpop.permute.xlu0 %963  ;;  %v1083_v37 = vpop.permute.xlu1 %1082 }
 0x1bb   : > { %v1202_v39 = vpop.permute.xlu1 %1201 }
 0x1df   : > { %v724_v22 = vpop.trf.xlu0 }
 0x1e3   : > { %v725_v23 = vpop.trf.xlu0 }
 0x1e4   : > { %v740_v24 = vpack.c.bf16 %v725_v23, %v724_v22  ;;  %v1809_v25 = vpack.c.bf16 %v725_v23, %v725_v23 }
 0x1e6   : > { %744 = vst.msk [vmem:[#allocation2] sm:$0xf] %vm743_vm2, %v740_v24  ;;  %757 = vst.msk [vmem:[#allocation2 + $0x4] sm:$0xf] %vm743_vm2, %v1809_v25 }
 0x1e7   : > { %v726_v26 = vpop.trf.xlu0 }
 0x1eb   : > { %v727_v27 = vpop.trf.xlu0 }
 0x1ec   : > { %v741_v28 = vpack.c.bf16 %v727_v27, %v726_v26  ;;  %v1810_v29 = vpack.c.bf16 %v727_v27, %v727_v27 }
 0x1ed   : > { %v849_v30 = vld [vmem:[#allocation2] sm:$0xf]  ;;  %v961_v32 = vld [vmem:[#allocation2 + $0x4] sm:$0xf] }
 0x1ee   : > { %764 = vst.msk [vmem:[#allocation2 + $0x8] sm:$0xf] %vm743_vm2, %v741_v28  ;;  %775 = vst.msk [vmem:[#allocation2 + $0xc] sm:$0xf] %vm743_vm2, %v1810_v29  ;;  %v856_v31 = vsel %vm854_vm3, %v849_v30, 0  ;;  %v969_v33 = vsel %vm854_vm3, %v961_v32, 0 }
 0x1ef   : > { %1864 = vmatpush3.bf16.msra.mxu0 %v856_v31 }
 0x1f0   : > { %1875 = vmatprep.subr.bf16.mxu0 %v2317_v0 }
 0x1f2   : > { %1866 = vmatmul.mubr.msk.bf16.vlgmr.msra.gmra.mxu0 %vm850_vm4, %v848_v16 }
 0x1f3   : > { %1876 = vmatpush3.bf16.msra.mxu0 %v969_v33  ;;  %1877 = vmatprep.mubr.msk.bf16.mxu0 %vm2318_vm0, %v2317_v0 }
 0x1f4   : > { %1887 = vmatprep.subr.bf16.mxu0 %v2317_v0 }
 0x1f5   : > { %v1081_v34 = vld [vmem:[#allocation2 + $0x8] sm:$0xf]  ;;  %v1200_v36 = vld [vmem:[#allocation2 + $0xc] sm:$0xf] }
 0x1f6   : > { %v1088_v35 = vsel %vm854_vm3, %v1081_v34, 0  ;;  %v1207_v38 = vsel %vm854_vm3, %v1200_v36, 0 }
 0x1fa   : > { %1878 = vmatmul.mubr.msk.bf16.vlgmr.msra.gmra.mxu0 %vm850_vm4, %v964_v21 }
 0x1fb   : > { %1888 = vmatpush3.bf16.msra.mxu0 %v1088_v35  ;;  %1889 = vmatprep.mubr.msk.bf16.mxu0 %vm2318_vm0, %v2317_v0 }
 0x1fc   : > { %1899 = vmatprep.subr.bf16.mxu0 %v2317_v0 }
 0x202   : > { %1890 = vmatmul.mubr.msk.bf16.vlgmr.msra.gmra.mxu0 %vm850_vm4, %v1083_v37 }
 0x203   : > { %1900 = vmatpush3.bf16.msra.mxu0 %v1207_v38  ;;  %1901 = vmatprep.mubr.msk.bf16.mxu0 %vm2318_vm0, %v2317_v0 }
 0x204   : > { %1911 = vmatprep.subr.bf16.mxu0 %v2317_v0 }
 0x20a   : > { %1902 = vmatmul.mubr.msk.bf16.vlgmr.msra.gmra.mxu0 %vm850_vm4, %v1202_v39 }
 0x20b   : > { %1915 = vmatprep.mubr.msk.bf16.mxu0 %vm2318_vm0, %v2317_v0 }
 0x2b2   : > { %v892_v40 = vpop.f32.mrf.mxu0 }
 0x2b3   : > { %v898_v41 = vsel %vm850_vm4, %v892_v40, -inf }
 0x2b4   : > { %899 = vmax.xlane.f32.xlu1 %v898_v41  ;;  %v1867_v42 = vpop.f32.mrf.mxu0 }
 0x2b6   : > { %v895_v43 = vpop.f32.mrf.mxu0 }
 0x2b8   : > { %v1868_v44 = vpop.f32.mrf.mxu0 }
 0x2ba   : > { %v1005_v45 = vpop.f32.mrf.mxu0 }
 0x2bb   : > { %v1011_v46 = vsel %vm850_vm4, %v1005_v45, -inf }
 0x2bc   : > { %1012 = vmax.xlane.f32.xlu0 %v1011_v46  ;;  %v1879_v47 = vpop.f32.mrf.mxu0 }
 0x2be   : > { %v1008_v48 = vpop.f32.mrf.mxu0 }
 0x2c0   : > { %v1880_v49 = vpop.f32.mrf.mxu0 }
 0x2c2   : > { %v1124_v50 = vpop.f32.mrf.mxu0 }
 0x2c3   : > { %v1130_v51 = vsel %vm850_vm4, %v1124_v50, -inf }
 0x2c4   : > { %1131 = vmax.xlane.f32.xlu1 %v1130_v51  ;;  %v1891_v52 = vpop.f32.mrf.mxu0 }
 0x2c6   : > { %v1127_v53 = vpop.f32.mrf.mxu0 }
 0x2c8   : > { %v1892_v54 = vpop.f32.mrf.mxu0 }
 0x2ca   : > { %v1243_v55 = vpop.f32.mrf.mxu0 }
 0x2cb   : > { %v1249_v56 = vsel %vm850_vm4, %v1243_v55, -inf }
 0x2cc   : > { %1250 = vmax.xlane.f32.xlu1 %v1249_v56  ;;  %v1903_v57 = vpop.f32.mrf.mxu0 }
 0x2ce   : > { %v1246_v58 = vpop.f32.mrf.mxu0 }
 0x2d0   : > { %v1904_v60 = vpop.f32.mrf.mxu0 }
 0x2d2   : > { %758 = vrot.lane.b32.xlu0 %v1808_v59, %s2322_s19 }
 0x2d6   : > { %765 = vrot.lane.b32.xlu0 %v1808_v59, %s2323_s18 }
 0x2da   : > { %776 = vrot.lane.b32.xlu0 %v1808_v59, %s2324_s15  ;;  %s2812_s15 = sld [smem:[#allocation31_spill]] }
 0x33d   : > { %v900_v61 = vpop.xlane.xlu1 %899 }
 0x33e   : > { %v901_v62 = vsub.f32 %v892_v40, %v900_v61 }
 0x340   : > { %v902_v63 = vmul.f32 1.442695, %v901_v62  ;;  %v2060_v62 = vld [vmem:[#allocation8 + $0x8] sm:$0xff]  }
 0x341   : > { %1912 = vmatpush3.bf16.msra.mxu0 %v2060_v62 }
 0x342   : > { %2068 = vpow2.f32 %v902_v63  ;;  %v2061_v63 = vld [vmem:[#allocation8] sm:$0xff]   ;;  %1913 = vmatprep.subr.bf16.mxu0 %v2317_v0 }
 0x345   : > { %v1013_v1 = vpop.xlane.xlu0 %1012  ;;  %1914 = vmatpush3.bf16.msra.mxu0 %v2061_v63  ;;  %v1802_v63 = vld [vmem:[%s2810_s25] ss:$0 sm:$0xff] }
 0x346   : > { %v1014_v2 = vsub.f32 %v1005_v45, %v1013_v1  ;;  %1927 = vmatprep.subr.bf16.mxu0 %v2317_v0 }
 0x348   : > { %v1015_v3 = vmul.f32 1.442695, %v1014_v2 }
 0x349   : > { %v759_v4 = vpop.permute.xlu0 %758 }
 0x34a   : > { %2070 = vpow2.f32 %v1015_v3  ;;  %762 = vst.msk [vmem:[#allocation3 + $0x4] sm:$0xf] %vm743_vm2, %v759_v4 }
 0x34d   : > { %v1132_v5 = vpop.xlane.xlu1 %1131  ;;  %v766_v7 = vpop.permute.xlu0 %765 }
 0x34e   : > { %v1133_v8 = vsub.f32 %v1124_v50, %v1132_v5  ;;  %769 = vst.msk [vmem:[#allocation3 + $0x8] sm:$0xf] %vm743_vm2, %v766_v7 }
 0x34f   : > { %v2069_v9 = vpop.eup %2068 }
 0x350   : > { %v1134_v10 = vmul.f32 1.442695, %v1133_v8  ;;  %v904_v11 = vsel %vm850_vm4, %v2069_v9, 0.0 }
 0x351   : > { %905 = vadd.xlane.f32.xlu1 %v904_v11  ;;  %v777_v12 = vpop.permute.xlu0 %776  ;;  %v1024_v30 = vld [vmem:[#allocation3 + $0x4] sm:$0xf]  ;;  %v1786_v11 = vld [vmem:[#allocation10] ss:$0 sm:$0xff] }
 0x352   : > { %2072 = vpow2.f32 %v1134_v10  ;;  %780 = vst.msk [vmem:[#allocation3 + $0xc] sm:$0xf] %vm743_vm2, %v777_v12  ;;  %v1029_v33 = vsel %vm854_vm3, %v1024_v30, 0 }
 0x355   : > { %v1251_v17 = vpop.xlane.xlu1 %1250  ;;  %v1143_v35 = vld [vmem:[#allocation3 + $0x8] sm:$0xf] }
 0x356   : > { %v1252_v18 = vsub.f32 %v1243_v55, %v1251_v17  ;;  %v1148_v38 = vsel %vm854_vm3, %v1143_v35, 0 }
 0x357   : > { %v2071_v13 = vpop.eup %2070 }
 0x358   : > { %v1017_v14 = vsel %vm850_vm4, %v2071_v13, 0.0  ;;  %v1253_v19 = vmul.f32 1.442695, %v1252_v18 }
 0x359   : > { %1018 = vadd.xlane.f32.xlu1 %v1017_v14  ;;  %v1262_v40 = vld [vmem:[#allocation3 + $0xc] sm:$0xf] }
 0x35a   : > { %2074 = vpow2.f32 %v1253_v19  ;;  %v1267_v42 = vsel %vm854_vm3, %v1262_v40, 0 }
 0x35f   : > { %v2073_v15 = vpop.eup %2072 }
 0x360   : > { %v1136_v16 = vsel %vm850_vm4, %v2073_v15, 0.0 }
 0x361   : > { %1137 = vadd.xlane.f32.xlu1 %v1136_v16 }
 0x367   : > { %v2075_v20 = vpop.eup %2074 }
 0x368   : > { %v1255_v21 = vsel %vm850_vm4, %v2075_v20, 0.0 }
 0x372   : > { %748 = vrot.lane.b32.xlu1 %v1808_v59, %s2325_s11  ;;  %s1612_s11 = scalar_lea.hbm %s2812_s15, %s1805_s28 }
 0x396   : > { %1256 = vadd.xlane.f32.xlu1 %v1255_v21 }
 0x3da   : > { %v906_v22 = vpop.xlane.xlu1 %905 }
 0x3db   : > { %2076 = vrcp.f32 %v906_v22 }
 0x3e2   : > { %v1019_v23 = vpop.xlane.xlu1 %1018 }
 0x3e3   : > { %2078 = vrcp.f32 %v1019_v23 }
 0x3e8   : > { %v2077_v26 = vpop.eup %2076 }
 0x3e9   : > { %v908_v27 = vmul.f32 %v2077_v26, %v2069_v9  ;;  %v2065_v26 = vld [vmem:[%s2770_s10 + $0x10] sm:$0xff]  }
 0x3ea   : > { %v1138_v24 = vpop.xlane.xlu1 %1137 }
 0x3eb   : > { %2080 = vrcp.f32 %v1138_v24  ;;  %v909_v31 = vpack.c.bf16 %v908_v27, %v908_v27  ;;  %v2062_v24 = vld [vmem:[#allocation11 + $0x8] sm:$0xff]  }
 0x3ee   : > { %v749_v25 = vpop.permute.xlu1 %748 }
 0x3ef   : > { %751 = vst.msk [vmem:[#allocation3] sm:$0xf] %vm743_vm2, %v749_v25  ;;  %v2063_v25 = vld [vmem:[#allocation11] sm:$0xff]  }
 0x3f0   : > { %v2079_v32 = vpop.eup %2078 }
 0x3f1   : > { %v1021_v34 = vmul.f32 %v2079_v32, %v2071_v13 }
 0x3f3   : > { %v1022_v36 = vpack.c.bf16 %v1021_v34, %v1021_v34 }
 0x3f6   : > { %v910_v28 = vld [vmem:[#allocation3] sm:$0xf] }
 0x3f7   : > { %v915_v29 = vsel %vm854_vm3, %v910_v28, 0 }
 0x3f8   : > { %1870 = vmatpush3.bf16.msra.mxu1 %v915_v29  ;;  %v2081_v37 = vpop.eup %2080 }
 0x3f9   : > { %1881 = vmatprep.subr.bf16.mxu1 %v2317_v0  ;;  %v1140_v39 = vmul.f32 %v2081_v37, %v2073_v15  ;;  %v2066_v37 = vld [vmem:[%s2770_s10 + $0x8] sm:$0xff]  }
 0x3fb   : > { %1872 = vmatmul.mubr.msk.bf16.vlgmr.msra.gmra.mxu1 %vm850_vm4, %v909_v31  ;;  %v1141_v41 = vpack.c.bf16 %v1140_v39, %v1140_v39  ;;  %v1790_v31 = vld [vmem:[%s2772_s12] ss:$0 sm:$0xff]  ;;  %v1792_v39 = vld [vmem:[#allocation13] ss:$0 sm:$0xff] }
 0x3fc   : > { %1882 = vmatpush3.bf16.msra.mxu1 %v1029_v33  ;;  %1883 = vmatprep.mubr.msk.bf16.mxu1 %vm2318_vm0, %v2317_v0  ;;  %v1791_v33 = vld [vmem:[%s2773_s13] ss:$0 sm:$0xff] }
 0x3fd   : > { %1893 = vmatprep.subr.bf16.mxu1 %v2317_v0 }
 0x403   : > { %1884 = vmatmul.mubr.msk.bf16.vlgmr.msra.gmra.mxu1 %vm850_vm4, %v1022_v36 }
 0x404   : > { %1894 = vmatpush3.bf16.msra.mxu1 %v1148_v38  ;;  %1895 = vmatprep.mubr.msk.bf16.mxu1 %vm2318_vm0, %v2317_v0  ;;  %v2067_v38 = vld [vmem:[%s2770_s10] sm:$0xff]  }
 0x405   : > { %1905 = vmatprep.subr.bf16.mxu1 %v2317_v0 }
 0x40b   : > { %1896 = vmatmul.mubr.msk.bf16.vlgmr.msra.gmra.mxu1 %vm850_vm4, %v1141_v41 }
 0x40c   : > { %1906 = vmatpush3.bf16.msra.mxu1 %v1267_v42  ;;  %1907 = vmatprep.mubr.msk.bf16.mxu1 %vm2318_vm0, %v2317_v0 }
 0x40d   : > { %1919 = vmatprep.subr.bf16.mxu1 %v2317_v0 }
 0x41f   : > { %v1257_v43 = vpop.xlane.xlu1 %1256 }
 0x420   : > { %2082 = vrcp.f32 %v1257_v43 }
 0x42d   : > { %v2083_v44 = vpop.eup %2082 }
 0x42e   : > { %v1259_v45 = vmul.f32 %v2083_v44, %v2075_v20 }
 0x430   : > { %v1260_v46 = vpack.c.bf16 %v1259_v45, %v1259_v45 }
 0x432   : > { %1908 = vmatmul.mubr.msk.bf16.vlgmr.msra.gmra.mxu1 %vm850_vm4, %v1260_v46 }
 0x433   : > { %1923 = vmatprep.mubr.msk.bf16.mxu1 %vm2318_vm0, %v2317_v0  ;;  %1920 = vmatpush3.bf16.msra.mxu1 %v2062_v24 }
 0x434   : > { %1921 = vmatprep.subr.bf16.mxu1 %v2317_v0 }
 0x437   : > { %1922 = vmatpush3.bf16.msra.mxu1 %v2063_v25 }
 0x4bb   : > { %v951_v47 = vpop.f32.mrf.mxu1 }
 0x4bc   : > { %v957_v48 = vpack.c.bf16 %v951_v47, %v951_v47 }
 0x4bd   : > { %v1873_v49 = vpop.f32.mrf.mxu1 }
 0x4be   : > { %959 = vst.msk [vmem:[#allocation4] sm:$0xf] %vm743_vm2, %v957_v48 }
 0x4bf   : > { %v954_v50 = vpop.f32.mrf.mxu1 }
 0x4c1   : > { %v1874_v51 = vpop.f32.mrf.mxu1 }
 0x4c3   : > { %v1065_v52 = vpop.f32.mrf.mxu1 }
 0x4c4   : > { %v1811_v53 = vpack.c.bf16 %v1065_v52, %v1065_v52 }
 0x4c5   : > { %v1885_v54 = vpop.f32.mrf.mxu1 }
 0x4c6   : > { %1075 = vrot.lane.b32.xlu1 %v1811_v53, %s2326_s20  ;;  %s1600_s20 = scalar_lea.sflag [#allocation7], %s2555_s7 }
 0x4c7   : > { %v1068_v55 = vpop.f32.mrf.mxu1 }
 0x4c9   : > { %v1886_v56 = vpop.f32.mrf.mxu1 }
 0x4cb   : > { %v1184_v57 = vpop.f32.mrf.mxu1 }
 0x4cc   : > { %v1812_v58 = vpack.c.bf16 %v1184_v57, %v1184_v57 }
 0x4cd   : > { %v1897_v59 = vpop.f32.mrf.mxu1 }
 0x4ce   : > { %1194 = vrot.lane.b32.xlu0 %v1812_v58, %s2327_s27  ;;  %s2809_s27 = sld [smem:[#allocation28_spill]] }
 0x4cf   : > { %v1187_v60 = vpop.f32.mrf.mxu1 }
 0x4d1   : > { %v1898_v61 = vpop.f32.mrf.mxu1 }
 0x4d4   : > { %v1796_v47 = vld [vmem:[%s2809_s27] ss:$0 sm:$0xff] }
 0x4f2   : > { %v1303_v1 = vpop.f32.mrf.mxu1 }
 0x4f3   : > { %v1813_v2 = vpack.c.bf16 %v1303_v1, %v1303_v1 }
 0x4f4   : > { %v1909_v3 = vpop.f32.mrf.mxu1 }
 0x4f5   : > { %1313 = vrot.lane.b32.xlu0 %v1813_v2, %s2328_s17  ;;  %s1762_s17 = sshll.u32 %s2555_s7, 3  ;;  %v1803_v2 = vld [vmem:[%s2811_s21] ss:$0 sm:$0xff] }
 0x4f6   : > { %v1306_v4 = vpop.f32.mrf.mxu1  ;;  %s625_s29 = scalar_lea.vmem [#allocation14], %s1762_s17 }
 0x4f7   : > { %s1614_s0 = sshll.u32 %s625_s29, 4  ;;  %s1615_s0 = int_to_ptr.vmem [resolvable:$true] %s1614_s0 }
 0x4f8   : > { %v1910_v5 = vpop.f32.mrf.mxu1  ;;  %s2220_s27 = scalar_lea.vmem %s1615_s0, 128  ;;  %p2227_p2 = scmp.lt.s32.totalorder %s1615_s0, %s2225_s9 }
 0x4f9   : > { %p2221_p1 = scmp.ne.s32.totalorder %s1615_s0, %s2220_s27  ;;  %p2228_p7 = scmp.lt.s32.totalorder %s2226_s24, %s2220_s27 }
 0x4fb   : > { %p2222_p10 = pnand %p2221_p1, %p2525_p12  ;;  %p2229_p4 = por %p2228_p7, %p2227_p2 }
 0x4fd   : > { %p2223_p0 = pneg %p2222_p10 }
 0x4ff   : > { %p2230_p5 = pnand %p2229_p4, %p2223_p0 }
 0x538   : > { %v1076_v7 = vpop.permute.xlu1 %1075 }
 0x539   : > { %1079 = vst.msk [vmem:[#allocation4] sm:$0xf] %vm1078_vm5, %v1076_v7 }
 0x540   : > { %v1195_v8 = vpop.permute.xlu0 %1194 }
 0x541   : > { %1198 = vst.msk [vmem:[#allocation4] sm:$0xf] %vm1197_vm6, %v1195_v8 }
 0x567   : > { %v1314_v9 = vpop.permute.xlu0 %1313 }
 0x568   : > { %1317 = vst.msk [vmem:[#allocation4] sm:$0xf] %vm1316_vm7, %v1314_v9 }
 0x56f   : > { %v1318_v10 = vld [vmem:[#allocation4] sm:$0xf] }
 0x570   : > { %1916 = vmatmul.mubr.msk.bf16.vlgmr.msra.gmra.mxu0 %vm664_vm1, %v1318_v10 }
 0x571   : > { %1935 = vmatprep.mubr.msk.bf16.mxu0 %vm2318_vm0, %v2317_v0 }
 0x630   : > { %v1379_v12 = vpop.f32.mrf.mxu0 }
 0x631   : > { %v1380_v13 = vadd.f32 %v1786_v11, %v1379_v12 }
 0x632   : > { %v1917_v14 = vpop.f32.mrf.mxu0 }
 0x633   : > { %v1385_v15 = vadd.f32 %v1380_v13, %v2599_v6  ;;  %v2064_v6 = vld [vmem:[%s2770_s10 + $0x18] sm:$0xff]  }
 0x634   : > { %v1382_v16 = vpop.f32.mrf.mxu0  ;;  %1928 = vmatpush3.bf16.msra.mxu0 %v2064_v6 }
 0x635   : > { %v1388_v17 = vsel %vm664_vm1, %v1385_v15, 0.0  ;;  %1929 = vmatprep.subr.bf16.mxu0 %v2317_v0 }
 0x636   : > { %1389 = vadd.xlane.f32.xlu0 %v1388_v17  ;;  %v1918_v18 = vpop.f32.mrf.mxu0 }
 0x638   : > { %1930 = vmatpush3.bf16.msra.mxu0 %v2065_v26 }
 0x639   : > { %1931 = vmatprep.subr.bf16.mxu0 %v2317_v0 }
 0x63c   : > { %1932 = vmatpush3.bf16.msra.mxu0 %v2066_v37 }
 0x63d   : > { %1933 = vmatprep.subr.bf16.mxu0 %v2317_v0 }
 0x640   : > { %1934 = vmatpush3.bf16.msra.mxu0 %v2067_v38 }
 0x6bf   : > { %v1390_v19 = vpop.xlane.xlu0 %1389 }
 0x6c0   : > { %v1392_v20 = vmul.f32 0.03125, %v1390_v19 }
 0x6c2   : > { %v1393_v21 = vsub.f32 %v1385_v15, %v1392_v20 }
 0x6c4   : > { %v1394_v22 = vmul.f32 %v1393_v21, %v1393_v21 }
 0x6c6   : > { %v1395_v23 = vsel %vm664_vm1, %v1394_v22, 0.0 }
 0x6c7   : > { %1396 = vadd.xlane.f32.xlu1 %v1395_v23 }
 0x750   : > { %v1397_v27 = vpop.xlane.xlu1 %1396 }
 0x751   : > { %v1398_v28 = vmul.f32 0.03125, %v1397_v27 }
 0x753   : > { %v1399_v29 = vadd.f32 1e-05, %v1398_v28 }
 0x755   : > { %2084 = vrsqrt.f32 %v1399_v29 }
 0x762   : > { %v2085_v30 = vpop.eup %2084 }
 0x763   : > { %v1401_v32 = vmul.f32 %v2085_v30, %v1393_v21 }
 0x765   : > { %v1408_v34 = vmul.f32 %v1790_v31, %v1401_v32 }
 0x767   : > { %v1415_v35 = vadd.f32 %v1791_v33, %v1408_v34 }
 0x769   : > { %v1416_v36 = vpack.c.bf16 %v1415_v35, %v1415_v35 }
 0x76b   : > { %1924 = vmatmul.mubr.msk.bf16.vlgmr.msra.gmra.mxu1 %vm664_vm1, %v1416_v36 }
 0x82b   : > { %v1477_v40 = vpop.f32.mrf.mxu1 }
 0x82c   : > { %v1478_v41 = vadd.f32 %v1792_v39, %v1477_v40 }
 0x82d   : > { %v1925_v42 = vpop.f32.mrf.mxu1 }
 0x82e   : > { %v1483_v43 = vmax.f32 %v1478_v41, 0.0 }
 0x82f   : > { %v1480_v44 = vpop.f32.mrf.mxu1 }
 0x830   : > { %v1484_v45 = vpack.c.bf16 %v1483_v43, %v1483_v43 }
 0x831   : > { %v1926_v46 = vpop.f32.mrf.mxu1 }
 0x832   : > { %1936 = vmatmul.mubr.msk.bf16.vlgmr.msra.gmra.mxu0 %vm1524_vm8, %v1484_v45 }
 0x8f2   : > { %v1562_v0 = vpop.f32.mrf.mxu0 }
 0x8f3   : > { %v1563_v48 = vadd.f32 %v1796_v47, %v1562_v0 }
 0x8f4   : > { %v1937_v49 = vpop.f32.mrf.mxu0 }
 0x8f5   : > { %v1568_v50 = vadd.f32 %v1563_v48, %v1415_v35 }
 0x8f6   : > { %v1565_v51 = vpop.f32.mrf.mxu0 }
 0x8f7   : > { %v1571_v52 = vsel %vm664_vm1, %v1568_v50, 0.0 }
 0x8f8   : > { %1572 = vadd.xlane.f32.xlu0 %v1571_v52  ;;  %v1938_v53 = vpop.f32.mrf.mxu0 }
 0x981   : > { %v1573_v54 = vpop.xlane.xlu0 %1572 }
 0x982   : > { %v1574_v55 = vmul.f32 0.03125, %v1573_v54 }
 0x984   : > { %v1575_v56 = vsub.f32 %v1568_v50, %v1574_v55 }
 0x986   : > { %v1576_v57 = vmul.f32 %v1575_v56, %v1575_v56 }
 0x988   : > { %v1577_v58 = vsel %vm664_vm1, %v1576_v57, 0.0 }
 0x989   : > { %1578 = vadd.xlane.f32.xlu0 %v1577_v58 }
 0xa12   : > { %v1579_v59 = vpop.xlane.xlu0 %1578 }
 0xa13   : > { %v1580_v60 = vmul.f32 0.03125, %v1579_v59 }
 0xa15   : > { %v1581_v61 = vadd.f32 1e-05, %v1580_v60 }
 0xa17   : > { %2086 = vrsqrt.f32 %v1581_v61 }
 0xa24   : > { %v2087_v62 = vpop.eup %2086 }
 0xa25   : > { %v1583_v1 = vmul.f32 %v2087_v62, %v1575_v56 }
 0xa27   : > { %v1590_v3 = vmul.f32 %v1802_v63, %v1583_v1 }
 0xa29   : > { %v1597_v4 = vadd.f32 %v1803_v2, %v1590_v3 }
 0xa2b   : > { %1598 = vst.msk [vmem:[%s625_s29] sm:$0xff] %vm664_vm1, %v1597_v4 }
 0xa2c   : > { %2233 = shalt.err (!%p2230_p5)
}
 0xa2d   : > { %s2234_s17 = scalar_lea.hbm %s1612_s11, 128  ;;  %s2238_s14 = scalar_lea.hbm %s2812_s15, 256 }
 0xa2e   : > { %p2235_p9 = scmp.ne.s32.totalorder %s1612_s11, %s2234_s17  ;;  %p2239_p13 = scmp.lt.s32.totalorder %s1612_s11, %s2812_s15 }
 0xa2f   : > { %p2240_p8 = scmp.lt.s32.totalorder %s2238_s14, %s2234_s17 }
 0xa30   : > { %p2236_p6 = pnand %p2235_p9, %p2525_p12 }
 0xa31   : > { %p2241_p3 = por %p2240_p8, %p2239_p13 }
 0xa32   : > { %p2237_p11 = pneg %p2236_p6 }
 0xa34   : > { %p2242_p1 = pnand %p2241_p3, %p2237_p11 }
 0xa36   : > { %2245 = shalt.err (!%p2242_p1)
}
 0xa37   : > { %1957 = dma.vmem_to_hbm [thread:$0]  (%p2525_p12), %s1615_s0, 128, %s1612_s11, %s1600_s20  }
 0xa38 PF: > { %s2813_s28 = sld [smem:[#allocation19_spill]]  ;;  %p2814_p10 = scmp.ne.s32.totalorder %s2806_s16, 0 }
 0xa39   : > { %p2815_p0 = scmp.ge.s32.totalorder %s2308_s26, 2 }
 0xa3b   : > { %p1977_p2 = pnand %p2815_p0, %p2814_p10 }
 0xa3d   : > { %p1978_p7 = pneg %p1977_p2 }
 0xa3e   : > { %s1626_s29 = sand.u32 1, %s2813_s28  }
 0xa3f   : > { %s1627_s19 = scalar_lea.sflag [#allocation7], %s1626_s29 }
 0xa40   : > { %2283 = dma.done.wait (%p1978_p7), %s1627_s19, 128  }
 0xa41   : > { %2285 = vsyncadd (%p1978_p7), %s1627_s19, 4294967168  ;;  %s34_s26 = sadd.s32 1, %s2308_s26   ;;  %s2816_s18 = sld [smem:[#allocation22_spill]] }
 0xa42   : > { %p31_p4 = scmp.ge.s32.totalorder %s34_s26, 4   ;;  %s2817_s24 = sld [smem:[#allocation20_spill]] }
 0xa43   : > { %s2818_s25 = sld [smem:[#allocation21_spill]]  ;;  %s2819_s21 = smov %s2292_s22 }
 0xa44   : > { %s2820_s22 = smov %s2296_s23  ;;  %33 = sbr.rel (!%p31_p4) target bundleno = 18 (0x12), region = 164 }
 0xa47   : > { %s2821_s23 = smov %s2816_s18 }
 0xa49   :  { %1632 = vsyncpa [#allocation6], 1 }
 0xa4a   :  { %1634 = vsyncpa [#allocation6 + $0x1], 1 }
 0xa4b   :  { %1635 = vsyncpa [#allocation9], 1 }
 0xa4c   :  { %1636 = vsyncpa [#allocation12], 1 }
 0xa4d   :  { %1637 = vsyncpa [#allocation7], 1 }
 0xa4e   :  { %1639 = vsyncpa [#allocation7 + $0x1], 1 }

</bundles_post_ra>
